<compile_context>
chip_gen: v6e
topology: v6e:2x2x1
jax: 0.10.0
libtpu: 0.0.40
codegen_flags: <defaults>
</compile_context>

<pallas_src>
import functools
import math

import jax
import jax.numpy as jnp
from jax import lax
from jax.experimental import pallas as pl
from jax.experimental.pallas import tpu as pltpu


# ---------------------------------------------------------------------------
# Fused kernel: projections + attention + head-avg weights + output projection
# ---------------------------------------------------------------------------

def _fused_mha_kernel(q_ref, k_ref, v_ref,
                      wq_ref, bq_ref, wk_ref, bk_ref, wv_ref, bv_ref,
                      wo_ref, bo_ref,
                      out_ref, w_ref,
                      attn_ref,
                      *, num_heads, head_dim, scale):
    """One (batch, q-tile) per grid step.

    q_ref : (1, BQ, Eq)   k_ref/v_ref : (1, Sk, Ek/Ev)
    w*_ref: bf16 weight matrices (in, out), resident across the grid
    b*_ref: f32 biases (1, E)
    out_ref: (1, BQ, E)   w_ref: (1, BQ, Sk) head-averaged attention weights
    attn_ref: (BQ, E) f32 VMEM scratch holding the concatenated head outputs
    """
    f32 = jnp.float32
    bf16 = jnp.bfloat16

    xq = q_ref[0].astype(bf16)          # (BQ, Eq)
    xk = k_ref[0].astype(bf16)          # (Sk, Ek)
    xv = v_ref[0].astype(bf16)          # (Sk, Ev)

    # Fused input projections: bf16 operands, f32 accumulation on the MXU.
    q = jnp.dot(xq, wq_ref[...], preferred_element_type=f32) + bq_ref[...]
    k = jnp.dot(xk, wk_ref[...], preferred_element_type=f32) + bk_ref[...]
    v = jnp.dot(xv, wv_ref[...], preferred_element_type=f32) + bv_ref[...]

    # Fold 1/sqrt(D) into Q once (instead of scaling every (BQ,Sk) score mat).
    q = (q * scale).astype(bf16)
    k = k.astype(bf16)
    v = v.astype(bf16)

    bq_rows = q.shape[0]
    sk = k.shape[0]
    w_acc = jnp.zeros((bq_rows, sk), f32)

    # Contract last dims of q_h and k_h directly -> no materialized K^T.
    dn = (((1,), (1,)), ((), ()))

    # Static (unrolled) loop over heads.  Per-head attention output is written
    # into its column slot of the (BQ, E) scratch; the head merge then becomes
    # a single full-K out-projection matmul after the loop.
    for h in range(num_heads):
        lo = h * head_dim
        hi = lo + head_dim
        qh = lax.slice_in_dim(q, lo, hi, axis=1)        # (BQ, D) bf16
        kh = lax.slice_in_dim(k, lo, hi, axis=1)        # (Sk, D) bf16
        vh = lax.slice_in_dim(v, lo, hi, axis=1)        # (Sk, D) bf16

        scores = lax.dot_general(qh, kh, dn, preferred_element_type=f32)
        m = jnp.max(scores, axis=-1, keepdims=True)
        e = jnp.exp(scores - m)
        s = jnp.sum(e, axis=-1, keepdims=True)
        p = e * pl.reciprocal(s, approx=True)           # EUP reciprocal

        w_acc = w_acc + p
        ah = jnp.dot(p.astype(bf16), vh, preferred_element_type=f32)  # (BQ, D)
        attn_ref[:, lo:hi] = ah

    # Single fused out-projection: (BQ, E) @ (E, E), full-width contraction.
    out = jnp.dot(attn_ref[...].astype(bf16), wo_ref[...],
                  preferred_element_type=f32) + bo_ref[...]
    out_ref[0] = out.astype(out_ref.dtype)
    w_ref[0] = (w_acc * (1.0 / num_heads)).astype(w_ref.dtype)


# ---------------------------------------------------------------------------
# Wrapper
# ---------------------------------------------------------------------------

def _choose_block_q(sq, max_bq=512):
    """Largest Sq tile <= max_bq that divides Sq (prefer multiples of 8)."""
    if sq <= max_bq:
        return sq
    for bq in range(max_bq, 7, -1):
        if sq % bq == 0 and bq % 8 == 0:
            return bq
    for bq in range(max_bq, 0, -1):
        if sq % bq == 0:
            return bq
    return sq


def _vmem_limit_bytes():
    """~3/4 of physical VMEM (≈96 MiB on v5e/v6e, ≈48 MiB on v7x)."""
    try:
        cap = pltpu.get_tpu_info().vmem_capacity_bytes
        return int(min(cap * 3 // 4, 100 * 1024 * 1024))
    except Exception:
        return 48 * 1024 * 1024


def multi_head_attention_forward(query, key, value, params, num_heads,
                                 block_q=None):
    """Mirrors BaseMultiHeadAttention.forward (no masks, eval mode).

    query : [B, Sq, E]   key/value : [B, Sk, kdim/vdim]
    Returns (output [B, Sq, E], avg_attn_weights [B, Sq, Sk]).
    """
    B, Sq, Eq = query.shape
    _, Sk, Ek = key.shape
    Ev = value.shape[2]
    E = params["wq"].shape[1]
    D = E // num_heads
    assert D * num_heads == E, "embed_dim must be divisible by num_heads"
    scale = 1.0 / math.sqrt(D)

    if block_q is None:
        block_q = _choose_block_q(Sq)
    assert Sq % block_q == 0
    n_q = Sq // block_q

    kernel = functools.partial(_fused_mha_kernel, num_heads=num_heads,
                               head_dim=D, scale=scale)

    # Weights in bf16 (halves DMA + resident VMEM; matmuls accumulate in f32).
    wq = params["wq"].astype(jnp.bfloat16)
    wk = params["wk"].astype(jnp.bfloat16)
    wv = params["wv"].astype(jnp.bfloat16)
    wo = params["wo"].astype(jnp.bfloat16)
    bq = params["bq"].reshape(1, E)
    bk = params["bk"].reshape(1, E)
    bv = params["bv"].reshape(1, E)
    bo = params["bo"].reshape(1, E)

    def build(buffered_weights):
        def const_spec(shape):
            zero = lambda b, qi: (0,) * len(shape)
            if buffered_weights:
                # Grid-invariant operand: single buffer, no re-DMA.
                return pl.BlockSpec(shape, zero,
                                    pipeline_mode=pl.Buffered(buffer_count=1))
            return pl.BlockSpec(shape, zero)

        in_specs = [
            pl.BlockSpec((1, block_q, Eq), lambda b, qi: (b, qi, 0)),
            pl.BlockSpec((1, Sk, Ek), lambda b, qi: (b, 0, 0)),
            pl.BlockSpec((1, Sk, Ev), lambda b, qi: (b, 0, 0)),
            const_spec((Eq, E)), const_spec((1, E)),
            const_spec((Ek, E)), const_spec((1, E)),
            const_spec((Ev, E)), const_spec((1, E)),
            const_spec((E, E)), const_spec((1, E)),
        ]
        out_specs = (
            pl.BlockSpec((1, block_q, E), lambda b, qi: (b, qi, 0)),
            pl.BlockSpec((1, block_q, Sk), lambda b, qi: (b, qi, 0)),
        )
        return pl.pallas_call(
            kernel,
            out_shape=(
                jax.ShapeDtypeStruct((B, Sq, E), jnp.float32),
                jax.ShapeDtypeStruct((B, Sq, Sk), jnp.float32),
            ),
            grid=(B, n_q),
            in_specs=in_specs,
            out_specs=out_specs,
            scratch_shapes=[pltpu.VMEM((block_q, E), jnp.float32)],
            compiler_params=pltpu.CompilerParams(
                dimension_semantics=("parallel", "parallel"),
                vmem_limit_bytes=_vmem_limit_bytes()),
        )

    args = (query, key, value, wq, bq, wk, bk, wv, bv, wo, bo)
    try:
        return build(True)(*args)
    except Exception:
        # Fallback if pipeline_mode=Buffered(1) is rejected by this jax build.
        return build(False)(*args)


# ---------------------------------------------------------------------------
# Parameter init (matches _reset_parameters: xavier_uniform weights, zero bias)
# ---------------------------------------------------------------------------

def init_params(key, embed_dim, kdim=None, vdim=None):
    kdim = embed_dim if kdim is None else kdim
    vdim = embed_dim if vdim is None else vdim

    def xavier(k, fan_in, fan_out):
        bound = math.sqrt(6.0 / (fan_in + fan_out))
        # stored in (in, out) layout, i.e. W.T of the PyTorch Linear
        return jax.random.uniform(k, (fan_in, fan_out), jnp.float32, -bound, bound)

    kq, kk, kv, ko = jax.random.split(key, 4)
    return {
        "wq": xavier(kq, embed_dim, embed_dim),
        "bq": jnp.zeros((embed_dim,), jnp.float32),
        "wk": xavier(kk, kdim, embed_dim),
        "bk": jnp.zeros((embed_dim,), jnp.float32),
        "wv": xavier(kv, vdim, embed_dim),
        "bv": jnp.zeros((embed_dim,), jnp.float32),
        "wo": xavier(ko, embed_dim, embed_dim),
        "bo": jnp.zeros((embed_dim,), jnp.float32),
    }


# ---------------------------------------------------------------------------
# Pure-JAX f32 reference for correctness check
# ---------------------------------------------------------------------------

def reference_forward(query, key, value, params, num_heads):
    B, S, E = query.shape
    D = E // num_heads
    Q = (query @ params["wq"] + params["bq"]).reshape(B, S, num_heads, D).transpose(0, 2, 1, 3)
    K = (key @ params["wk"] + params["bk"]).reshape(B, -1, num_heads, D).transpose(0, 2, 1, 3)
    V = (value @ params["wv"] + params["bv"]).reshape(B, -1, num_heads, D).transpose(0, 2, 1, 3)
    scores = jnp.einsum("bhqd,bhkd->bhqk", Q, K) / math.sqrt(D)
    w = jax.nn.softmax(scores, axis=-1)
    o = jnp.einsum("bhqk,bhkd->bhqd", w, V).transpose(0, 2, 1, 3).reshape(B, S, E)
    out = o @ params["wo"] + params["bo"]
    return out, w.mean(axis=1)


# ---------------------------------------------------------------------------
# Main
# ---------------------------------------------------------------------------

if __name__ == "__main__":
    B, S, E, H = 2, 8, 32, 4  # batch, seq, embed_dim, num_heads (head_dim = 8)

    root = jax.random.PRNGKey(0)
    kparam, kq, kk, kv = jax.random.split(root, 4)

    params = init_params(kparam, E)
    query = jax.random.normal(kq, (B, S, E), jnp.float32)
    key = jax.random.normal(kk, (B, S, E), jnp.float32)
    value = jax.random.normal(kv, (B, S, E), jnp.float32)

    out, avg_w = multi_head_attention_forward(query, key, value, params, H)
    out = jax.block_until_ready(out)
    avg_w = jax.block_until_ready(avg_w)

    ref_out, ref_w = reference_forward(query, key, value, params, H)
    assert out.shape == (B, S, E)
    assert avg_w.shape == (B, S, S)
    # Tolerances loosened vs pure-f32: matmul operands are bf16 (f32 accum)
    # and the softmax denominator uses the EUP approximate reciprocal.
    assert jnp.allclose(out, ref_out, atol=5e-2, rtol=5e-2)
    assert jnp.allclose(avg_w, ref_w, atol=3e-2, rtol=3e-2)
    # Softmax rows must (approximately) sum to 1.
    assert jnp.allclose(avg_w.sum(axis=-1), 1.0, atol=1e-2)

    print("KERNEL_OK")
</pallas_src>

<mosaic_0001>
module attributes {stable_mosaic.version = 11 : i64} {
  func.func @_fused_mha_kernel(%arg0: i32, %arg1: i32, %arg2: memref<1x8x32xf32, #tpu.memory_space<vmem>>, %arg3: memref<1x8x32xf32, #tpu.memory_space<vmem>>, %arg4: memref<1x8x32xf32, #tpu.memory_space<vmem>>, %arg5: memref<32x32xbf16, #tpu.memory_space<vmem>>, %arg6: memref<1x32xf32, #tpu.memory_space<vmem>>, %arg7: memref<32x32xbf16, #tpu.memory_space<vmem>>, %arg8: memref<1x32xf32, #tpu.memory_space<vmem>>, %arg9: memref<32x32xbf16, #tpu.memory_space<vmem>>, %arg10: memref<1x32xf32, #tpu.memory_space<vmem>>, %arg11: memref<32x32xbf16, #tpu.memory_space<vmem>>, %arg12: memref<1x32xf32, #tpu.memory_space<vmem>>, %arg13: memref<1x8x32xf32, #tpu.memory_space<vmem>>, %arg14: memref<1x8x8xf32, #tpu.memory_space<vmem>>, %arg15: memref<8x32xf32, #tpu.memory_space<vmem>>) attributes {dimension_semantics = [#tpu.dimension_semantics<parallel>, #tpu.dimension_semantics<parallel>], iteration_bounds = array<i64: 2, 1>, scalar_prefetch = 0 : i64, scratch_operands = 1 : i64, tpu.core_type = #tpu.core_type<tc>, window_params = [{transform_indices = @transform_0, window_bounds = array<i64: 1, 8, 32>}, {transform_indices = @transform_1, window_bounds = array<i64: 1, 8, 32>}, {transform_indices = @transform_2, window_bounds = array<i64: 1, 8, 32>}, {pipeline_mode = #tpu.pipeline_mode<synchronous>, transform_indices = @transform_3, window_bounds = array<i64: 32, 32>}, {pipeline_mode = #tpu.pipeline_mode<synchronous>, transform_indices = @transform_4, window_bounds = array<i64: 1, 32>}, {pipeline_mode = #tpu.pipeline_mode<synchronous>, transform_indices = @transform_5, window_bounds = array<i64: 32, 32>}, {pipeline_mode = #tpu.pipeline_mode<synchronous>, transform_indices = @transform_6, window_bounds = array<i64: 1, 32>}, {pipeline_mode = #tpu.pipeline_mode<synchronous>, transform_indices = @transform_7, window_bounds = array<i64: 32, 32>}, {pipeline_mode = #tpu.pipeline_mode<synchronous>, transform_indices = @transform_8, window_bounds = array<i64: 1, 32>}, {pipeline_mode = #tpu.pipeline_mode<synchronous>, transform_indices = @transform_9, window_bounds = array<i64: 32, 32>}, {pipeline_mode = #tpu.pipeline_mode<synchronous>, transform_indices = @transform_10, window_bounds = array<i64: 1, 32>}, {transform_indices = @transform_11, window_bounds = array<i64: 1, 8, 32>}, {transform_indices = @transform_12, window_bounds = array<i64: 1, 8, 8>}]} {
    %c0 = arith.constant 0 : index
    %c0_0 = arith.constant 0 : index
    %c0_1 = arith.constant 0 : index
    %0 = vector.load %arg2[%c0, %c0_0, %c0_1] : memref<1x8x32xf32, #tpu.memory_space<vmem>>, vector<1x8x32xf32>
    %1 = vector.shape_cast %0 : vector<1x8x32xf32> to vector<8x32xf32>
    %2 = arith.truncf %1 : vector<8x32xf32> to vector<8x32xbf16>
    %c0_2 = arith.constant 0 : index
    %c0_3 = arith.constant 0 : index
    %c0_4 = arith.constant 0 : index
    %3 = vector.load %arg3[%c0_2, %c0_3, %c0_4] : memref<1x8x32xf32, #tpu.memory_space<vmem>>, vector<1x8x32xf32>
    %4 = vector.shape_cast %3 : vector<1x8x32xf32> to vector<8x32xf32>
    %5 = arith.truncf %4 : vector<8x32xf32> to vector<8x32xbf16>
    %c0_5 = arith.constant 0 : index
    %c0_6 = arith.constant 0 : index
    %c0_7 = arith.constant 0 : index
    %6 = vector.load %arg4[%c0_5, %c0_6, %c0_7] : memref<1x8x32xf32, #tpu.memory_space<vmem>>, vector<1x8x32xf32>
    %7 = vector.shape_cast %6 : vector<1x8x32xf32> to vector<8x32xf32>
    %8 = arith.truncf %7 : vector<8x32xf32> to vector<8x32xbf16>
    %c0_8 = arith.constant 0 : index
    %c0_9 = arith.constant 0 : index
    %9 = vector.load %arg5[%c0_8, %c0_9] : memref<32x32xbf16, #tpu.memory_space<vmem>>, vector<32x32xbf16>
    %cst = arith.constant dense<0.000000e+00> : vector<8x32xf32>
    %10 = tpu.matmul %2, %9, %cst {dimension_numbers = #tpu.dot_dimension_numbers<[1], [0], [0], [1], [0, 0, 1, 1], [], []>} : vector<8x32xbf16>, vector<32x32xbf16>, vector<8x32xf32> -> vector<8x32xf32>
    %c0_10 = arith.constant 0 : index
    %c0_11 = arith.constant 0 : index
    %11 = vector.load %arg6[%c0_10, %c0_11] : memref<1x32xf32, #tpu.memory_space<vmem>>, vector<1x32xf32>
    %12 = vector.broadcast %11 : vector<1x32xf32> to vector<8x32xf32>
    %13 = arith.addf %10, %12 : vector<8x32xf32>
    %c0_12 = arith.constant 0 : index
    %c0_13 = arith.constant 0 : index
    %14 = vector.load %arg7[%c0_12, %c0_13] : memref<32x32xbf16, #tpu.memory_space<vmem>>, vector<32x32xbf16>
    %cst_14 = arith.constant dense<0.000000e+00> : vector<8x32xf32>
    %15 = tpu.matmul %5, %14, %cst_14 {dimension_numbers = #tpu.dot_dimension_numbers<[1], [0], [0], [1], [0, 0, 1, 1], [], []>} : vector<8x32xbf16>, vector<32x32xbf16>, vector<8x32xf32> -> vector<8x32xf32>
    %c0_15 = arith.constant 0 : index
    %c0_16 = arith.constant 0 : index
    %16 = vector.load %arg8[%c0_15, %c0_16] : memref<1x32xf32, #tpu.memory_space<vmem>>, vector<1x32xf32>
    %17 = vector.broadcast %16 : vector<1x32xf32> to vector<8x32xf32>
    %18 = arith.addf %15, %17 : vector<8x32xf32>
    %c0_17 = arith.constant 0 : index
    %c0_18 = arith.constant 0 : index
    %19 = vector.load %arg9[%c0_17, %c0_18] : memref<32x32xbf16, #tpu.memory_space<vmem>>, vector<32x32xbf16>
    %cst_19 = arith.constant dense<0.000000e+00> : vector<8x32xf32>
    %20 = tpu.matmul %8, %19, %cst_19 {dimension_numbers = #tpu.dot_dimension_numbers<[1], [0], [0], [1], [0, 0, 1, 1], [], []>} : vector<8x32xbf16>, vector<32x32xbf16>, vector<8x32xf32> -> vector<8x32xf32>
    %c0_20 = arith.constant 0 : index
    %c0_21 = arith.constant 0 : index
    %21 = vector.load %arg10[%c0_20, %c0_21] : memref<1x32xf32, #tpu.memory_space<vmem>>, vector<1x32xf32>
    %22 = vector.broadcast %21 : vector<1x32xf32> to vector<8x32xf32>
    %23 = arith.addf %20, %22 : vector<8x32xf32>
    %cst_22 = arith.constant 0.353553385 : f32
    %24 = vector.broadcast %cst_22 : f32 to vector<8x32xf32>
    %25 = arith.mulf %13, %24 : vector<8x32xf32>
    %26 = arith.truncf %25 : vector<8x32xf32> to vector<8x32xbf16>
    %27 = arith.truncf %18 : vector<8x32xf32> to vector<8x32xbf16>
    %28 = arith.truncf %23 : vector<8x32xf32> to vector<8x32xbf16>
    %cst_23 = arith.constant 0.000000e+00 : f32
    %29 = vector.broadcast %cst_23 : f32 to vector<8x8xf32>
    %30 = vector.extract_strided_slice %26 {offsets = [0, 0], sizes = [8, 8], strides = [1, 1]} : vector<8x32xbf16> to vector<8x8xbf16>
    %31 = vector.extract_strided_slice %27 {offsets = [0, 0], sizes = [8, 8], strides = [1, 1]} : vector<8x32xbf16> to vector<8x8xbf16>
    %32 = vector.extract_strided_slice %28 {offsets = [0, 0], sizes = [8, 8], strides = [1, 1]} : vector<8x32xbf16> to vector<8x8xbf16>
    %cst_24 = arith.constant dense<0.000000e+00> : vector<8x8xf32>
    %33 = tpu.matmul %30, %31, %cst_24 {dimension_numbers = #tpu.dot_dimension_numbers<[1], [1], [0], [0], [0, 0, 1, 0], [], []>} : vector<8x8xbf16>, vector<8x8xbf16>, vector<8x8xf32> -> vector<8x8xf32>
    %cst_25 = arith.constant dense<0xFF800000> : vector<8xf32>
    %34 = vector.multi_reduction <maximumf>, %33, %cst_25 [1] : vector<8x8xf32> to vector<8xf32>
    %35 = vector.shape_cast %34 : vector<8xf32> to vector<8x1xf32>
    %36 = vector.broadcast %35 : vector<8x1xf32> to vector<8x8xf32>
    %37 = arith.subf %33, %36 : vector<8x8xf32>
    %38 = math.exp %37 : vector<8x8xf32>
    %cst_26 = arith.constant dense<0.000000e+00> : vector<8xf32>
    %39 = vector.multi_reduction <add>, %38, %cst_26 [1] : vector<8x8xf32> to vector<8xf32>
    %40 = vector.shape_cast %39 : vector<8xf32> to vector<8x1xf32>
    %41 = tpu.reciprocal %40 {approx = true} : vector<8x1xf32> -> vector<8x1xf32>
    %42 = vector.broadcast %41 : vector<8x1xf32> to vector<8x8xf32>
    %43 = arith.mulf %38, %42 : vector<8x8xf32>
    %44 = arith.addf %29, %43 : vector<8x8xf32>
    %45 = arith.truncf %43 : vector<8x8xf32> to vector<8x8xbf16>
    %cst_27 = arith.constant dense<0.000000e+00> : vector<8x8xf32>
    %46 = tpu.matmul %45, %32, %cst_27 {dimension_numbers = #tpu.dot_dimension_numbers<[1], [0], [0], [1], [0, 0, 1, 1], [], []>} : vector<8x8xbf16>, vector<8x8xbf16>, vector<8x8xf32> -> vector<8x8xf32>
    %c0_28 = arith.constant 0 : index
    %c0_29 = arith.constant 0 : index
    %47 = vector.load %arg15[%c0_28, %c0_29] : memref<8x32xf32, #tpu.memory_space<vmem>>, vector<8x8xf32>
    tpu.vector_store %arg15[%c0_28, %c0_29], %46 {strides = array<i32>} : memref<8x32xf32, #tpu.memory_space<vmem>>, vector<8x8xf32>,
    %48 = vector.extract_strided_slice %26 {offsets = [0, 8], sizes = [8, 8], strides = [1, 1]} : vector<8x32xbf16> to vector<8x8xbf16>
    %49 = vector.extract_strided_slice %27 {offsets = [0, 8], sizes = [8, 8], strides = [1, 1]} : vector<8x32xbf16> to vector<8x8xbf16>
    %50 = vector.extract_strided_slice %28 {offsets = [0, 8], sizes = [8, 8], strides = [1, 1]} : vector<8x32xbf16> to vector<8x8xbf16>
    %cst_30 = arith.constant dense<0.000000e+00> : vector<8x8xf32>
    %51 = tpu.matmul %48, %49, %cst_30 {dimension_numbers = #tpu.dot_dimension_numbers<[1], [1], [0], [0], [0, 0, 1, 0], [], []>} : vector<8x8xbf16>, vector<8x8xbf16>, vector<8x8xf32> -> vector<8x8xf32>
    %cst_31 = arith.constant dense<0xFF800000> : vector<8xf32>
    %52 = vector.multi_reduction <maximumf>, %51, %cst_31 [1] : vector<8x8xf32> to vector<8xf32>
    %53 = vector.shape_cast %52 : vector<8xf32> to vector<8x1xf32>
    %54 = vector.broadcast %53 : vector<8x1xf32> to vector<8x8xf32>
    %55 = arith.subf %51, %54 : vector<8x8xf32>
    %56 = math.exp %55 : vector<8x8xf32>
    %cst_32 = arith.constant dense<0.000000e+00> : vector<8xf32>
    %57 = vector.multi_reduction <add>, %56, %cst_32 [1] : vector<8x8xf32> to vector<8xf32>
    %58 = vector.shape_cast %57 : vector<8xf32> to vector<8x1xf32>
    %59 = tpu.reciprocal %58 {approx = true} : vector<8x1xf32> -> vector<8x1xf32>
    %60 = vector.broadcast %59 : vector<8x1xf32> to vector<8x8xf32>
    %61 = arith.mulf %56, %60 : vector<8x8xf32>
    %62 = arith.addf %44, %61 : vector<8x8xf32>
    %63 = arith.truncf %61 : vector<8x8xf32> to vector<8x8xbf16>
    %cst_33 = arith.constant dense<0.000000e+00> : vector<8x8xf32>
    %64 = tpu.matmul %63, %50, %cst_33 {dimension_numbers = #tpu.dot_dimension_numbers<[1], [0], [0], [1], [0, 0, 1, 1], [], []>} : vector<8x8xbf16>, vector<8x8xbf16>, vector<8x8xf32> -> vector<8x8xf32>
    %c0_34 = arith.constant 0 : index
    %c8 = arith.constant 8 : index
    %65 = vector.load %arg15[%c0_34, %c8] : memref<8x32xf32, #tpu.memory_space<vmem>>, vector<8x8xf32>
    tpu.vector_store %arg15[%c0_34, %c8], %64 {strides = array<i32>} : memref<8x32xf32, #tpu.memory_space<vmem>>, vector<8x8xf32>,
    %66 = vector.extract_strided_slice %26 {offsets = [0, 16], sizes = [8, 8], strides = [1, 1]} : vector<8x32xbf16> to vector<8x8xbf16>
    %67 = vector.extract_strided_slice %27 {offsets = [0, 16], sizes = [8, 8], strides = [1, 1]} : vector<8x32xbf16> to vector<8x8xbf16>
    %68 = vector.extract_strided_slice %28 {offsets = [0, 16], sizes = [8, 8], strides = [1, 1]} : vector<8x32xbf16> to vector<8x8xbf16>
    %cst_35 = arith.constant dense<0.000000e+00> : vector<8x8xf32>
    %69 = tpu.matmul %66, %67, %cst_35 {dimension_numbers = #tpu.dot_dimension_numbers<[1], [1], [0], [0], [0, 0, 1, 0], [], []>} : vector<8x8xbf16>, vector<8x8xbf16>, vector<8x8xf32> -> vector<8x8xf32>
    %cst_36 = arith.constant dense<0xFF800000> : vector<8xf32>
    %70 = vector.multi_reduction <maximumf>, %69, %cst_36 [1] : vector<8x8xf32> to vector<8xf32>
    %71 = vector.shape_cast %70 : vector<8xf32> to vector<8x1xf32>
    %72 = vector.broadcast %71 : vector<8x1xf32> to vector<8x8xf32>
    %73 = arith.subf %69, %72 : vector<8x8xf32>
    %74 = math.exp %73 : vector<8x8xf32>
    %cst_37 = arith.constant dense<0.000000e+00> : vector<8xf32>
    %75 = vector.multi_reduction <add>, %74, %cst_37 [1] : vector<8x8xf32> to vector<8xf32>
    %76 = vector.shape_cast %75 : vector<8xf32> to vector<8x1xf32>
    %77 = tpu.reciprocal %76 {approx = true} : vector<8x1xf32> -> vector<8x1xf32>
    %78 = vector.broadcast %77 : vector<8x1xf32> to vector<8x8xf32>
    %79 = arith.mulf %74, %78 : vector<8x8xf32>
    %80 = arith.addf %62, %79 : vector<8x8xf32>
    %81 = arith.truncf %79 : vector<8x8xf32> to vector<8x8xbf16>
    %cst_38 = arith.constant dense<0.000000e+00> : vector<8x8xf32>
    %82 = tpu.matmul %81, %68, %cst_38 {dimension_numbers = #tpu.dot_dimension_numbers<[1], [0], [0], [1], [0, 0, 1, 1], [], []>} : vector<8x8xbf16>, vector<8x8xbf16>, vector<8x8xf32> -> vector<8x8xf32>
    %c0_39 = arith.constant 0 : index
    %c16 = arith.constant 16 : index
    %83 = vector.load %arg15[%c0_39, %c16] : memref<8x32xf32, #tpu.memory_space<vmem>>, vector<8x8xf32>
    tpu.vector_store %arg15[%c0_39, %c16], %82 {strides = array<i32>} : memref<8x32xf32, #tpu.memory_space<vmem>>, vector<8x8xf32>,
    %84 = vector.extract_strided_slice %26 {offsets = [0, 24], sizes = [8, 8], strides = [1, 1]} : vector<8x32xbf16> to vector<8x8xbf16>
    %85 = vector.extract_strided_slice %27 {offsets = [0, 24], sizes = [8, 8], strides = [1, 1]} : vector<8x32xbf16> to vector<8x8xbf16>
    %86 = vector.extract_strided_slice %28 {offsets = [0, 24], sizes = [8, 8], strides = [1, 1]} : vector<8x32xbf16> to vector<8x8xbf16>
    %cst_40 = arith.constant dense<0.000000e+00> : vector<8x8xf32>
    %87 = tpu.matmul %84, %85, %cst_40 {dimension_numbers = #tpu.dot_dimension_numbers<[1], [1], [0], [0], [0, 0, 1, 0], [], []>} : vector<8x8xbf16>, vector<8x8xbf16>, vector<8x8xf32> -> vector<8x8xf32>
    %cst_41 = arith.constant dense<0xFF800000> : vector<8xf32>
    %88 = vector.multi_reduction <maximumf>, %87, %cst_41 [1] : vector<8x8xf32> to vector<8xf32>
    %89 = vector.shape_cast %88 : vector<8xf32> to vector<8x1xf32>
    %90 = vector.broadcast %89 : vector<8x1xf32> to vector<8x8xf32>
    %91 = arith.subf %87, %90 : vector<8x8xf32>
    %92 = math.exp %91 : vector<8x8xf32>
    %cst_42 = arith.constant dense<0.000000e+00> : vector<8xf32>
    %93 = vector.multi_reduction <add>, %92, %cst_42 [1] : vector<8x8xf32> to vector<8xf32>
    %94 = vector.shape_cast %93 : vector<8xf32> to vector<8x1xf32>
    %95 = tpu.reciprocal %94 {approx = true} : vector<8x1xf32> -> vector<8x1xf32>
    %96 = vector.broadcast %95 : vector<8x1xf32> to vector<8x8xf32>
    %97 = arith.mulf %92, %96 : vector<8x8xf32>
    %98 = arith.addf %80, %97 : vector<8x8xf32>
    %99 = arith.truncf %97 : vector<8x8xf32> to vector<8x8xbf16>
    %cst_43 = arith.constant dense<0.000000e+00> : vector<8x8xf32>
    %100 = tpu.matmul %99, %86, %cst_43 {dimension_numbers = #tpu.dot_dimension_numbers<[1], [0], [0], [1], [0, 0, 1, 1], [], []>} : vector<8x8xbf16>, vector<8x8xbf16>, vector<8x8xf32> -> vector<8x8xf32>
    %c0_44 = arith.constant 0 : index
    %c24 = arith.constant 24 : index
    %101 = vector.load %arg15[%c0_44, %c24] : memref<8x32xf32, #tpu.memory_space<vmem>>, vector<8x8xf32>
    tpu.vector_store %arg15[%c0_44, %c24], %100 {strides = array<i32>} : memref<8x32xf32, #tpu.memory_space<vmem>>, vector<8x8xf32>,
    %c0_45 = arith.constant 0 : index
    %c0_46 = arith.constant 0 : index
    %102 = vector.load %arg15[%c0_45, %c0_46] : memref<8x32xf32, #tpu.memory_space<vmem>>, vector<8x32xf32>
    %103 = arith.truncf %102 : vector<8x32xf32> to vector<8x32xbf16>
    %c0_47 = arith.constant 0 : index
    %c0_48 = arith.constant 0 : index
    %104 = vector.load %arg11[%c0_47, %c0_48] : memref<32x32xbf16, #tpu.memory_space<vmem>>, vector<32x32xbf16>
    %cst_49 = arith.constant dense<0.000000e+00> : vector<8x32xf32>
    %105 = tpu.matmul %103, %104, %cst_49 {dimension_numbers = #tpu.dot_dimension_numbers<[1], [0], [0], [1], [0, 0, 1, 1], [], []>} : vector<8x32xbf16>, vector<32x32xbf16>, vector<8x32xf32> -> vector<8x32xf32>
    %c0_50 = arith.constant 0 : index
    %c0_51 = arith.constant 0 : index
    %106 = vector.load %arg12[%c0_50, %c0_51] : memref<1x32xf32, #tpu.memory_space<vmem>>, vector<1x32xf32>
    %107 = vector.broadcast %106 : vector<1x32xf32> to vector<8x32xf32>
    %108 = arith.addf %105, %107 : vector<8x32xf32>
    %c0_52 = arith.constant 0 : index
    %c0_53 = arith.constant 0 : index
    %c0_54 = arith.constant 0 : index
    %109 = vector.load %arg13[%c0_52, %c0_53, %c0_54] : memref<1x8x32xf32, #tpu.memory_space<vmem>>, vector<1x8x32xf32>
    %110 = vector.shape_cast %109 : vector<1x8x32xf32> to vector<8x32xf32>
    %111 = vector.shape_cast %108 : vector<8x32xf32> to vector<1x8x32xf32>
    tpu.vector_store %arg13[%c0_52, %c0_53, %c0_54], %111 {strides = array<i32>} : memref<1x8x32xf32, #tpu.memory_space<vmem>>, vector<1x8x32xf32>,
    %cst_55 = arith.constant 2.500000e-01 : f32
    %112 = vector.broadcast %cst_55 : f32 to vector<8x8xf32>
    %113 = arith.mulf %98, %112 : vector<8x8xf32>
    %c0_56 = arith.constant 0 : index
    %c0_57 = arith.constant 0 : index
    %c0_58 = arith.constant 0 : index
    %114 = vector.load %arg14[%c0_56, %c0_57, %c0_58] : memref<1x8x8xf32, #tpu.memory_space<vmem>>, vector<1x8x8xf32>
    %115 = vector.shape_cast %114 : vector<1x8x8xf32> to vector<8x8xf32>
    %116 = vector.shape_cast %113 : vector<8x8xf32> to vector<1x8x8xf32>
    tpu.vector_store %arg14[%c0_56, %c0_57, %c0_58], %116 {strides = array<i32>} : memref<1x8x8xf32, #tpu.memory_space<vmem>>, vector<1x8x8xf32>,
    return
  }
  func.func @transform_0(%arg0: i32, %arg1: i32) -> (i32, i32, i32) {
    %c0_i32 = arith.constant 0 : i32
    %c0_i32_0 = arith.constant 0 : i32
    return %arg0, %arg1, %c0_i32 : i32, i32, i32
  }
  func.func @transform_1(%arg0: i32, %arg1: i32) -> (i32, i32, i32) {
    %c0_i32 = arith.constant 0 : i32
    %c0_i32_0 = arith.constant 0 : i32
    %c0_i32_1 = arith.constant 0 : i32
    return %arg0, %c0_i32, %c0_i32_0 : i32, i32, i32
  }
  func.func @transform_2(%arg0: i32, %arg1: i32) -> (i32, i32, i32) {
    %c0_i32 = arith.constant 0 : i32
    %c0_i32_0 = arith.constant 0 : i32
    %c0_i32_1 = arith.constant 0 : i32
    return %arg0, %c0_i32, %c0_i32_0 : i32, i32, i32
  }
  func.func @transform_3(%arg0: i32, %arg1: i32) -> (i32, i32) {
    %c0_i32 = arith.constant 0 : i32
    %c0_i32_0 = arith.constant 0 : i32
    %c0_i32_1 = arith.constant 0 : i32
    return %c0_i32, %c0_i32_0 : i32, i32
  }
  func.func @transform_4(%arg0: i32, %arg1: i32) -> (i32, i32) {
    %c0_i32 = arith.constant 0 : i32
    %c0_i32_0 = arith.constant 0 : i32
    %c0_i32_1 = arith.constant 0 : i32
    return %c0_i32, %c0_i32_0 : i32, i32
  }
  func.func @transform_5(%arg0: i32, %arg1: i32) -> (i32, i32) {
    %c0_i32 = arith.constant 0 : i32
    %c0_i32_0 = arith.constant 0 : i32
    %c0_i32_1 = arith.constant 0 : i32
    return %c0_i32, %c0_i32_0 : i32, i32
  }
  func.func @transform_6(%arg0: i32, %arg1: i32) -> (i32, i32) {
    %c0_i32 = arith.constant 0 : i32
    %c0_i32_0 = arith.constant 0 : i32
    %c0_i32_1 = arith.constant 0 : i32
    return %c0_i32, %c0_i32_0 : i32, i32
  }
  func.func @transform_7(%arg0: i32, %arg1: i32) -> (i32, i32) {
    %c0_i32 = arith.constant 0 : i32
    %c0_i32_0 = arith.constant 0 : i32
    %c0_i32_1 = arith.constant 0 : i32
    return %c0_i32, %c0_i32_0 : i32, i32
  }
  func.func @transform_8(%arg0: i32, %arg1: i32) -> (i32, i32) {
    %c0_i32 = arith.constant 0 : i32
    %c0_i32_0 = arith.constant 0 : i32
    %c0_i32_1 = arith.constant 0 : i32
    return %c0_i32, %c0_i32_0 : i32, i32
  }
  func.func @transform_9(%arg0: i32, %arg1: i32) -> (i32, i32) {
    %c0_i32 = arith.constant 0 : i32
    %c0_i32_0 = arith.constant 0 : i32
    %c0_i32_1 = arith.constant 0 : i32
    return %c0_i32, %c0_i32_0 : i32, i32
  }
  func.func @transform_10(%arg0: i32, %arg1: i32) -> (i32, i32) {
    %c0_i32 = arith.constant 0 : i32
    %c0_i32_0 = arith.constant 0 : i32
    %c0_i32_1 = arith.constant 0 : i32
    return %c0_i32, %c0_i32_0 : i32, i32
  }
  func.func @transform_11(%arg0: i32, %arg1: i32) -> (i32, i32, i32) {
    %c0_i32 = arith.constant 0 : i32
    %c0_i32_0 = arith.constant 0 : i32
    return %arg0, %arg1, %c0_i32 : i32, i32, i32
  }
  func.func @transform_12(%arg0: i32, %arg1: i32) -> (i32, i32, i32) {
    %c0_i32 = arith.constant 0 : i32
    %c0_i32_0 = arith.constant 0 : i32
    return %arg0, %arg1, %c0_i32 : i32, i32, i32
  }
}

module attributes {stable_mosaic.version = 11 : i64} {
  func.func @_fused_mha_kernel(%arg0: i32, %arg1: i32, %arg2: memref<1x8x32xf32, #tpu.memory_space<vmem>>, %arg3: memref<1x8x32xf32, #tpu.memory_space<vmem>>, %arg4: memref<1x8x32xf32, #tpu.memory_space<vmem>>, %arg5: memref<32x32xbf16, #tpu.memory_space<vmem>>, %arg6: memref<1x32xf32, #tpu.memory_space<vmem>>, %arg7: memref<32x32xbf16, #tpu.memory_space<vmem>>, %arg8: memref<1x32xf32, #tpu.memory_space<vmem>>, %arg9: memref<32x32xbf16, #tpu.memory_space<vmem>>, %arg10: memref<1x32xf32, #tpu.memory_space<vmem>>, %arg11: memref<32x32xbf16, #tpu.memory_space<vmem>>, %arg12: memref<1x32xf32, #tpu.memory_space<vmem>>, %arg13: memref<1x8x32xf32, #tpu.memory_space<vmem>>, %arg14: memref<1x8x8xf32, #tpu.memory_space<vmem>>, %arg15: memref<8x32xf32, #tpu.memory_space<vmem>>) attributes {dimension_semantics = [#tpu.dimension_semantics<parallel>, #tpu.dimension_semantics<parallel>], iteration_bounds = array<i64: 2, 1>, scalar_prefetch = 0 : i64, scratch_operands = 1 : i64, tpu.core_type = #tpu.core_type<tc>, window_params = [{transform_indices = @transform_0, window_bounds = array<i64: 1, 8, 32>}, {transform_indices = @transform_1, window_bounds = array<i64: 1, 8, 32>}, {transform_indices = @transform_2, window_bounds = array<i64: 1, 8, 32>}, {pipeline_mode = #tpu.pipeline_mode<synchronous>, transform_indices = @transform_3, window_bounds = array<i64: 32, 32>}, {pipeline_mode = #tpu.pipeline_mode<synchronous>, transform_indices = @transform_4, window_bounds = array<i64: 1, 32>}, {pipeline_mode = #tpu.pipeline_mode<synchronous>, transform_indices = @transform_5, window_bounds = array<i64: 32, 32>}, {pipeline_mode = #tpu.pipeline_mode<synchronous>, transform_indices = @transform_6, window_bounds = array<i64: 1, 32>}, {pipeline_mode = #tpu.pipeline_mode<synchronous>, transform_indices = @transform_7, window_bounds = array<i64: 32, 32>}, {pipeline_mode = #tpu.pipeline_mode<synchronous>, transform_indices = @transform_8, window_bounds = array<i64: 1, 32>}, {pipeline_mode = #tpu.pipeline_mode<synchronous>, transform_indices = @transform_9, window_bounds = array<i64: 32, 32>}, {pipeline_mode = #tpu.pipeline_mode<synchronous>, transform_indices = @transform_10, window_bounds = array<i64: 1, 32>}, {transform_indices = @transform_11, window_bounds = array<i64: 1, 8, 32>}, {transform_indices = @transform_12, window_bounds = array<i64: 1, 8, 8>}]} {
    %c0 = arith.constant 0 : index
    %c0_0 = arith.constant 0 : index
    %c0_1 = arith.constant 0 : index
    %0 = vector.load %arg2[%c0, %c0_0, %c0_1] : memref<1x8x32xf32, #tpu.memory_space<vmem>>, vector<1x8x32xf32>
    %1 = vector.shape_cast %0 : vector<1x8x32xf32> to vector<8x32xf32>
    %2 = arith.truncf %1 : vector<8x32xf32> to vector<8x32xbf16>
    %c0_2 = arith.constant 0 : index
    %c0_3 = arith.constant 0 : index
    %c0_4 = arith.constant 0 : index
    %3 = vector.load %arg3[%c0_2, %c0_3, %c0_4] : memref<1x8x32xf32, #tpu.memory_space<vmem>>, vector<1x8x32xf32>
    %4 = vector.shape_cast %3 : vector<1x8x32xf32> to vector<8x32xf32>
    %5 = arith.truncf %4 : vector<8x32xf32> to vector<8x32xbf16>
    %c0_5 = arith.constant 0 : index
    %c0_6 = arith.constant 0 : index
    %c0_7 = arith.constant 0 : index
    %6 = vector.load %arg4[%c0_5, %c0_6, %c0_7] : memref<1x8x32xf32, #tpu.memory_space<vmem>>, vector<1x8x32xf32>
    %7 = vector.shape_cast %6 : vector<1x8x32xf32> to vector<8x32xf32>
    %8 = arith.truncf %7 : vector<8x32xf32> to vector<8x32xbf16>
    %c0_8 = arith.constant 0 : index
    %c0_9 = arith.constant 0 : index
    %9 = vector.load %arg5[%c0_8, %c0_9] : memref<32x32xbf16, #tpu.memory_space<vmem>>, vector<32x32xbf16>
    %cst = arith.constant dense<0.000000e+00> : vector<8x32xf32>
    %10 = tpu.matmul %2, %9, %cst {dimension_numbers = #tpu.dot_dimension_numbers<[1], [0], [0], [1], [0, 0, 1, 1], [], []>} : vector<8x32xbf16>, vector<32x32xbf16>, vector<8x32xf32> -> vector<8x32xf32>
    %c0_10 = arith.constant 0 : index
    %c0_11 = arith.constant 0 : index
    %11 = vector.load %arg6[%c0_10, %c0_11] : memref<1x32xf32, #tpu.memory_space<vmem>>, vector<1x32xf32>
    %12 = vector.broadcast %11 : vector<1x32xf32> to vector<8x32xf32>
    %13 = arith.addf %10, %12 : vector<8x32xf32>
    %c0_12 = arith.constant 0 : index
    %c0_13 = arith.constant 0 : index
    %14 = vector.load %arg7[%c0_12, %c0_13] : memref<32x32xbf16, #tpu.memory_space<vmem>>, vector<32x32xbf16>
    %cst_14 = arith.constant dense<0.000000e+00> : vector<8x32xf32>
    %15 = tpu.matmul %5, %14, %cst_14 {dimension_numbers = #tpu.dot_dimension_numbers<[1], [0], [0], [1], [0, 0, 1, 1], [], []>} : vector<8x32xbf16>, vector<32x32xbf16>, vector<8x32xf32> -> vector<8x32xf32>
    %c0_15 = arith.constant 0 : index
    %c0_16 = arith.constant 0 : index
    %16 = vector.load %arg8[%c0_15, %c0_16] : memref<1x32xf32, #tpu.memory_space<vmem>>, vector<1x32xf32>
    %17 = vector.broadcast %16 : vector<1x32xf32> to vector<8x32xf32>
    %18 = arith.addf %15, %17 : vector<8x32xf32>
    %c0_17 = arith.constant 0 : index
    %c0_18 = arith.constant 0 : index
    %19 = vector.load %arg9[%c0_17, %c0_18] : memref<32x32xbf16, #tpu.memory_space<vmem>>, vector<32x32xbf16>
    %cst_19 = arith.constant dense<0.000000e+00> : vector<8x32xf32>
    %20 = tpu.matmul %8, %19, %cst_19 {dimension_numbers = #tpu.dot_dimension_numbers<[1], [0], [0], [1], [0, 0, 1, 1], [], []>} : vector<8x32xbf16>, vector<32x32xbf16>, vector<8x32xf32> -> vector<8x32xf32>
    %c0_20 = arith.constant 0 : index
    %c0_21 = arith.constant 0 : index
    %21 = vector.load %arg10[%c0_20, %c0_21] : memref<1x32xf32, #tpu.memory_space<vmem>>, vector<1x32xf32>
    %22 = vector.broadcast %21 : vector<1x32xf32> to vector<8x32xf32>
    %23 = arith.addf %20, %22 : vector<8x32xf32>
    %cst_22 = arith.constant 0.353553385 : f32
    %24 = vector.broadcast %cst_22 : f32 to vector<8x32xf32>
    %25 = arith.mulf %13, %24 : vector<8x32xf32>
    %26 = arith.truncf %25 : vector<8x32xf32> to vector<8x32xbf16>
    %27 = arith.truncf %18 : vector<8x32xf32> to vector<8x32xbf16>
    %28 = arith.truncf %23 : vector<8x32xf32> to vector<8x32xbf16>
    %cst_23 = arith.constant 0.000000e+00 : f32
    %29 = vector.broadcast %cst_23 : f32 to vector<8x8xf32>
    %30 = vector.extract_strided_slice %26 {offsets = [0, 0], sizes = [8, 8], strides = [1, 1]} : vector<8x32xbf16> to vector<8x8xbf16>
    %31 = vector.extract_strided_slice %27 {offsets = [0, 0], sizes = [8, 8], strides = [1, 1]} : vector<8x32xbf16> to vector<8x8xbf16>
    %32 = vector.extract_strided_slice %28 {offsets = [0, 0], sizes = [8, 8], strides = [1, 1]} : vector<8x32xbf16> to vector<8x8xbf16>
    %cst_24 = arith.constant dense<0.000000e+00> : vector<8x8xf32>
    %33 = tpu.matmul %30, %31, %cst_24 {dimension_numbers = #tpu.dot_dimension_numbers<[1], [1], [0], [0], [0, 0, 1, 0], [], []>} : vector<8x8xbf16>, vector<8x8xbf16>, vector<8x8xf32> -> vector<8x8xf32>
    %cst_25 = arith.constant dense<0xFF800000> : vector<8xf32>
    %34 = vector.multi_reduction <maximumf>, %33, %cst_25 [1] : vector<8x8xf32> to vector<8xf32>
    %35 = vector.shape_cast %34 : vector<8xf32> to vector<8x1xf32>
    %36 = vector.broadcast %35 : vector<8x1xf32> to vector<8x8xf32>
    %37 = arith.subf %33, %36 : vector<8x8xf32>
    %38 = math.exp %37 : vector<8x8xf32>
    %cst_26 = arith.constant dense<0.000000e+00> : vector<8xf32>
    %39 = vector.multi_reduction <add>, %38, %cst_26 [1] : vector<8x8xf32> to vector<8xf32>
    %40 = vector.shape_cast %39 : vector<8xf32> to vector<8x1xf32>
    %41 = tpu.reciprocal %40 {approx = true} : vector<8x1xf32> -> vector<8x1xf32>
    %42 = vector.broadcast %41 : vector<8x1xf32> to vector<8x8xf32>
    %43 = arith.mulf %38, %42 : vector<8x8xf32>
    %44 = arith.addf %29, %43 : vector<8x8xf32>
    %45 = arith.truncf %43 : vector<8x8xf32> to vector<8x8xbf16>
    %cst_27 = arith.constant dense<0.000000e+00> : vector<8x8xf32>
    %46 = tpu.matmul %45, %32, %cst_27 {dimension_numbers = #tpu.dot_dimension_numbers<[1], [0], [0], [1], [0, 0, 1, 1], [], []>} : vector<8x8xbf16>, vector<8x8xbf16>, vector<8x8xf32> -> vector<8x8xf32>
    %c0_28 = arith.constant 0 : index
    %c0_29 = arith.constant 0 : index
    %47 = vector.load %arg15[%c0_28, %c0_29] : memref<8x32xf32, #tpu.memory_space<vmem>>, vector<8x8xf32>
    tpu.vector_store %arg15[%c0_28, %c0_29], %46 {strides = array<i32>} : memref<8x32xf32, #tpu.memory_space<vmem>>, vector<8x8xf32>,
    %48 = vector.extract_strided_slice %26 {offsets = [0, 8], sizes = [8, 8], strides = [1, 1]} : vector<8x32xbf16> to vector<8x8xbf16>
    %49 = vector.extract_strided_slice %27 {offsets = [0, 8], sizes = [8, 8], strides = [1, 1]} : vector<8x32xbf16> to vector<8x8xbf16>
    %50 = vector.extract_strided_slice %28 {offsets = [0, 8], sizes = [8, 8], strides = [1, 1]} : vector<8x32xbf16> to vector<8x8xbf16>
    %cst_30 = arith.constant dense<0.000000e+00> : vector<8x8xf32>
    %51 = tpu.matmul %48, %49, %cst_30 {dimension_numbers = #tpu.dot_dimension_numbers<[1], [1], [0], [0], [0, 0, 1, 0], [], []>} : vector<8x8xbf16>, vector<8x8xbf16>, vector<8x8xf32> -> vector<8x8xf32>
    %cst_31 = arith.constant dense<0xFF800000> : vector<8xf32>
    %52 = vector.multi_reduction <maximumf>, %51, %cst_31 [1] : vector<8x8xf32> to vector<8xf32>
    %53 = vector.shape_cast %52 : vector<8xf32> to vector<8x1xf32>
    %54 = vector.broadcast %53 : vector<8x1xf32> to vector<8x8xf32>
    %55 = arith.subf %51, %54 : vector<8x8xf32>
    %56 = math.exp %55 : vector<8x8xf32>
    %cst_32 = arith.constant dense<0.000000e+00> : vector<8xf32>
    %57 = vector.multi_reduction <add>, %56, %cst_32 [1] : vector<8x8xf32> to vector<8xf32>
    %58 = vector.shape_cast %57 : vector<8xf32> to vector<8x1xf32>
    %59 = tpu.reciprocal %58 {approx = true} : vector<8x1xf32> -> vector<8x1xf32>
    %60 = vector.broadcast %59 : vector<8x1xf32> to vector<8x8xf32>
    %61 = arith.mulf %56, %60 : vector<8x8xf32>
    %62 = arith.addf %44, %61 : vector<8x8xf32>
    %63 = arith.truncf %61 : vector<8x8xf32> to vector<8x8xbf16>
    %cst_33 = arith.constant dense<0.000000e+00> : vector<8x8xf32>
    %64 = tpu.matmul %63, %50, %cst_33 {dimension_numbers = #tpu.dot_dimension_numbers<[1], [0], [0], [1], [0, 0, 1, 1], [], []>} : vector<8x8xbf16>, vector<8x8xbf16>, vector<8x8xf32> -> vector<8x8xf32>
    %c0_34 = arith.constant 0 : index
    %c8 = arith.constant 8 : index
    %65 = vector.load %arg15[%c0_34, %c8] : memref<8x32xf32, #tpu.memory_space<vmem>>, vector<8x8xf32>
    tpu.vector_store %arg15[%c0_34, %c8], %64 {strides = array<i32>} : memref<8x32xf32, #tpu.memory_space<vmem>>, vector<8x8xf32>,
    %66 = vector.extract_strided_slice %26 {offsets = [0, 16], sizes = [8, 8], strides = [1, 1]} : vector<8x32xbf16> to vector<8x8xbf16>
    %67 = vector.extract_strided_slice %27 {offsets = [0, 16], sizes = [8, 8], strides = [1, 1]} : vector<8x32xbf16> to vector<8x8xbf16>
    %68 = vector.extract_strided_slice %28 {offsets = [0, 16], sizes = [8, 8], strides = [1, 1]} : vector<8x32xbf16> to vector<8x8xbf16>
    %cst_35 = arith.constant dense<0.000000e+00> : vector<8x8xf32>
    %69 = tpu.matmul %66, %67, %cst_35 {dimension_numbers = #tpu.dot_dimension_numbers<[1], [1], [0], [0], [0, 0, 1, 0], [], []>} : vector<8x8xbf16>, vector<8x8xbf16>, vector<8x8xf32> -> vector<8x8xf32>
    %cst_36 = arith.constant dense<0xFF800000> : vector<8xf32>
    %70 = vector.multi_reduction <maximumf>, %69, %cst_36 [1] : vector<8x8xf32> to vector<8xf32>
    %71 = vector.shape_cast %70 : vector<8xf32> to vector<8x1xf32>
    %72 = vector.broadcast %71 : vector<8x1xf32> to vector<8x8xf32>
    %73 = arith.subf %69, %72 : vector<8x8xf32>
    %74 = math.exp %73 : vector<8x8xf32>
    %cst_37 = arith.constant dense<0.000000e+00> : vector<8xf32>
    %75 = vector.multi_reduction <add>, %74, %cst_37 [1] : vector<8x8xf32> to vector<8xf32>
    %76 = vector.shape_cast %75 : vector<8xf32> to vector<8x1xf32>
    %77 = tpu.reciprocal %76 {approx = true} : vector<8x1xf32> -> vector<8x1xf32>
    %78 = vector.broadcast %77 : vector<8x1xf32> to vector<8x8xf32>
    %79 = arith.mulf %74, %78 : vector<8x8xf32>
    %80 = arith.addf %62, %79 : vector<8x8xf32>
    %81 = arith.truncf %79 : vector<8x8xf32> to vector<8x8xbf16>
    %cst_38 = arith.constant dense<0.000000e+00> : vector<8x8xf32>
    %82 = tpu.matmul %81, %68, %cst_38 {dimension_numbers = #tpu.dot_dimension_numbers<[1], [0], [0], [1], [0, 0, 1, 1], [], []>} : vector<8x8xbf16>, vector<8x8xbf16>, vector<8x8xf32> -> vector<8x8xf32>
    %c0_39 = arith.constant 0 : index
    %c16 = arith.constant 16 : index
    %83 = vector.load %arg15[%c0_39, %c16] : memref<8x32xf32, #tpu.memory_space<vmem>>, vector<8x8xf32>
    tpu.vector_store %arg15[%c0_39, %c16], %82 {strides = array<i32>} : memref<8x32xf32, #tpu.memory_space<vmem>>, vector<8x8xf32>,
    %84 = vector.extract_strided_slice %26 {offsets = [0, 24], sizes = [8, 8], strides = [1, 1]} : vector<8x32xbf16> to vector<8x8xbf16>
    %85 = vector.extract_strided_slice %27 {offsets = [0, 24], sizes = [8, 8], strides = [1, 1]} : vector<8x32xbf16> to vector<8x8xbf16>
    %86 = vector.extract_strided_slice %28 {offsets = [0, 24], sizes = [8, 8], strides = [1, 1]} : vector<8x32xbf16> to vector<8x8xbf16>
    %cst_40 = arith.constant dense<0.000000e+00> : vector<8x8xf32>
    %87 = tpu.matmul %84, %85, %cst_40 {dimension_numbers = #tpu.dot_dimension_numbers<[1], [1], [0], [0], [0, 0, 1, 0], [], []>} : vector<8x8xbf16>, vector<8x8xbf16>, vector<8x8xf32> -> vector<8x8xf32>
    %cst_41 = arith.constant dense<0xFF800000> : vector<8xf32>
    %88 = vector.multi_reduction <maximumf>, %87, %cst_41 [1] : vector<8x8xf32> to vector<8xf32>
    %89 = vector.shape_cast %88 : vector<8xf32> to vector<8x1xf32>
    %90 = vector.broadcast %89 : vector<8x1xf32> to vector<8x8xf32>
    %91 = arith.subf %87, %90 : vector<8x8xf32>
    %92 = math.exp %91 : vector<8x8xf32>
    %cst_42 = arith.constant dense<0.000000e+00> : vector<8xf32>
    %93 = vector.multi_reduction <add>, %92, %cst_42 [1] : vector<8x8xf32> to vector<8xf32>
    %94 = vector.shape_cast %93 : vector<8xf32> to vector<8x1xf32>
    %95 = tpu.reciprocal %94 {approx = true} : vector<8x1xf32> -> vector<8x1xf32>
    %96 = vector.broadcast %95 : vector<8x1xf32> to vector<8x8xf32>
    %97 = arith.mulf %92, %96 : vector<8x8xf32>
    %98 = arith.addf %80, %97 : vector<8x8xf32>
    %99 = arith.truncf %97 : vector<8x8xf32> to vector<8x8xbf16>
    %cst_43 = arith.constant dense<0.000000e+00> : vector<8x8xf32>
    %100 = tpu.matmul %99, %86, %cst_43 {dimension_numbers = #tpu.dot_dimension_numbers<[1], [0], [0], [1], [0, 0, 1, 1], [], []>} : vector<8x8xbf16>, vector<8x8xbf16>, vector<8x8xf32> -> vector<8x8xf32>
    %c0_44 = arith.constant 0 : index
    %c24 = arith.constant 24 : index
    %101 = vector.load %arg15[%c0_44, %c24] : memref<8x32xf32, #tpu.memory_space<vmem>>, vector<8x8xf32>
    tpu.vector_store %arg15[%c0_44, %c24], %100 {strides = array<i32>} : memref<8x32xf32, #tpu.memory_space<vmem>>, vector<8x8xf32>,
    %c0_45 = arith.constant 0 : index
    %c0_46 = arith.constant 0 : index
    %102 = vector.load %arg15[%c0_45, %c0_46] : memref<8x32xf32, #tpu.memory_space<vmem>>, vector<8x32xf32>
    %103 = arith.truncf %102 : vector<8x32xf32> to vector<8x32xbf16>
    %c0_47 = arith.constant 0 : index
    %c0_48 = arith.constant 0 : index
    %104 = vector.load %arg11[%c0_47, %c0_48] : memref<32x32xbf16, #tpu.memory_space<vmem>>, vector<32x32xbf16>
    %cst_49 = arith.constant dense<0.000000e+00> : vector<8x32xf32>
    %105 = tpu.matmul %103, %104, %cst_49 {dimension_numbers = #tpu.dot_dimension_numbers<[1], [0], [0], [1], [0, 0, 1, 1], [], []>} : vector<8x32xbf16>, vector<32x32xbf16>, vector<8x32xf32> -> vector<8x32xf32>
    %c0_50 = arith.constant 0 : index
    %c0_51 = arith.constant 0 : index
    %106 = vector.load %arg12[%c0_50, %c0_51] : memref<1x32xf32, #tpu.memory_space<vmem>>, vector<1x32xf32>
    %107 = vector.broadcast %106 : vector<1x32xf32> to vector<8x32xf32>
    %108 = arith.addf %105, %107 : vector<8x32xf32>
    %c0_52 = arith.constant 0 : index
    %c0_53 = arith.constant 0 : index
    %c0_54 = arith.constant 0 : index
    %109 = vector.load %arg13[%c0_52, %c0_53, %c0_54] : memref<1x8x32xf32, #tpu.memory_space<vmem>>, vector<1x8x32xf32>
    %110 = vector.shape_cast %109 : vector<1x8x32xf32> to vector<8x32xf32>
    %111 = vector.shape_cast %108 : vector<8x32xf32> to vector<1x8x32xf32>
    tpu.vector_store %arg13[%c0_52, %c0_53, %c0_54], %111 {strides = array<i32>} : memref<1x8x32xf32, #tpu.memory_space<vmem>>, vector<1x8x32xf32>,
    %cst_55 = arith.constant 2.500000e-01 : f32
    %112 = vector.broadcast %cst_55 : f32 to vector<8x8xf32>
    %113 = arith.mulf %98, %112 : vector<8x8xf32>
    %c0_56 = arith.constant 0 : index
    %c0_57 = arith.constant 0 : index
    %c0_58 = arith.constant 0 : index
    %114 = vector.load %arg14[%c0_56, %c0_57, %c0_58] : memref<1x8x8xf32, #tpu.memory_space<vmem>>, vector<1x8x8xf32>
    %115 = vector.shape_cast %114 : vector<1x8x8xf32> to vector<8x8xf32>
    %116 = vector.shape_cast %113 : vector<8x8xf32> to vector<1x8x8xf32>
    tpu.vector_store %arg14[%c0_56, %c0_57, %c0_58], %116 {strides = array<i32>} : memref<1x8x8xf32, #tpu.memory_space<vmem>>, vector<1x8x8xf32>,
    return
  }
  func.func @transform_0(%arg0: i32, %arg1: i32) -> (i32, i32, i32) {
    %c0_i32 = arith.constant 0 : i32
    %c0_i32_0 = arith.constant 0 : i32
    return %arg0, %arg1, %c0_i32 : i32, i32, i32
  }
  func.func @transform_1(%arg0: i32, %arg1: i32) -> (i32, i32, i32) {
    %c0_i32 = arith.constant 0 : i32
    %c0_i32_0 = arith.constant 0 : i32
    %c0_i32_1 = arith.constant 0 : i32
    return %arg0, %c0_i32, %c0_i32_0 : i32, i32, i32
  }
  func.func @transform_2(%arg0: i32, %arg1: i32) -> (i32, i32, i32) {
    %c0_i32 = arith.constant 0 : i32
    %c0_i32_0 = arith.constant 0 : i32
    %c0_i32_1 = arith.constant 0 : i32
    return %arg0, %c0_i32, %c0_i32_0 : i32, i32, i32
  }
  func.func @transform_3(%arg0: i32, %arg1: i32) -> (i32, i32) {
    %c0_i32 = arith.constant 0 : i32
    %c0_i32_0 = arith.constant 0 : i32
    %c0_i32_1 = arith.constant 0 : i32
    return %c0_i32, %c0_i32_0 : i32, i32
  }
  func.func @transform_4(%arg0: i32, %arg1: i32) -> (i32, i32) {
    %c0_i32 = arith.constant 0 : i32
    %c0_i32_0 = arith.constant 0 : i32
    %c0_i32_1 = arith.constant 0 : i32
    return %c0_i32, %c0_i32_0 : i32, i32
  }
  func.func @transform_5(%arg0: i32, %arg1: i32) -> (i32, i32) {
    %c0_i32 = arith.constant 0 : i32
    %c0_i32_0 = arith.constant 0 : i32
    %c0_i32_1 = arith.constant 0 : i32
    return %c0_i32, %c0_i32_0 : i32, i32
  }
  func.func @transform_6(%arg0: i32, %arg1: i32) -> (i32, i32) {
    %c0_i32 = arith.constant 0 : i32
    %c0_i32_0 = arith.constant 0 : i32
    %c0_i32_1 = arith.constant 0 : i32
    return %c0_i32, %c0_i32_0 : i32, i32
  }
  func.func @transform_7(%arg0: i32, %arg1: i32) -> (i32, i32) {
    %c0_i32 = arith.constant 0 : i32
    %c0_i32_0 = arith.constant 0 : i32
    %c0_i32_1 = arith.constant 0 : i32
    return %c0_i32, %c0_i32_0 : i32, i32
  }
  func.func @transform_8(%arg0: i32, %arg1: i32) -> (i32, i32) {
    %c0_i32 = arith.constant 0 : i32
    %c0_i32_0 = arith.constant 0 : i32
    %c0_i32_1 = arith.constant 0 : i32
    return %c0_i32, %c0_i32_0 : i32, i32
  }
  func.func @transform_9(%arg0: i32, %arg1: i32) -> (i32, i32) {
    %c0_i32 = arith.constant 0 : i32
    %c0_i32_0 = arith.constant 0 : i32
    %c0_i32_1 = arith.constant 0 : i32
    return %c0_i32, %c0_i32_0 : i32, i32
  }
  func.func @transform_10(%arg0: i32, %arg1: i32) -> (i32, i32) {
    %c0_i32 = arith.constant 0 : i32
    %c0_i32_0 = arith.constant 0 : i32
    %c0_i32_1 = arith.constant 0 : i32
    return %c0_i32, %c0_i32_0 : i32, i32
  }
  func.func @transform_11(%arg0: i32, %arg1: i32) -> (i32, i32, i32) {
    %c0_i32 = arith.constant 0 : i32
    %c0_i32_0 = arith.constant 0 : i32
    return %arg0, %arg1, %c0_i32 : i32, i32, i32
  }
  func.func @transform_12(%arg0: i32, %arg1: i32) -> (i32, i32, i32) {
    %c0_i32 = arith.constant 0 : i32
    %c0_i32_0 = arith.constant 0 : i32
    return %arg0, %arg1, %c0_i32 : i32, i32, i32
  }
}

</mosaic_0001>

<bundles_post_ra>
// kernel: tpu_custom_call.1
= control target key start
LH: loop header
LB: loop body
LE: loop exit
PB: predicated region body
PF: predicated region fallthrough
CT: control target
= control target key end

     0   :  { %s2785_s0 = inlined_call_operand.hbm [shape: f32[2,8,32], index: 0, kind: input, shape index: {}]   ;;  %s2786_s1 = inlined_call_operand.hbm [shape: f32[2,8,32], index: 1, kind: input, shape index: {}]   ;;  %s2787_s2 = inlined_call_operand.hbm [shape: f32[2,8,32], index: 2, kind: input, shape index: {}]   ;;  %s2788_s3 = inlined_call_operand.hbm [shape: bf16[32,32], index: 3, kind: input, shape index: {}]   ;;  %s2789_s4 = inlined_call_operand.hbm [shape: f32[1,32], index: 4, kind: input, shape index: {}]   ;;  %s2790_s5 = inlined_call_operand.hbm [shape: bf16[32,32], index: 5, kind: input, shape index: {}]   ;;  %s2791_s6 = inlined_call_operand.hbm [shape: f32[1,32], index: 6, kind: input, shape index: {}]   ;;  %s2792_s7 = inlined_call_operand.hbm [shape: bf16[32,32], index: 7, kind: input, shape index: {}]   ;;  %s2793_s8 = inlined_call_operand.hbm [shape: f32[1,32], index: 8, kind: input, shape index: {}]   ;;  %s2794_s9 = inlined_call_operand.vmem [shape: bf16[32,32], index: 9, kind: input, shape index: {}]   ;;  %s2795_s10 = inlined_call_operand.vmem [shape: f32[1,32], index: 10, kind: input, shape index: {}]   ;;  %s2796_s11 = inlined_call_operand.hbm [shape: f32[2,8,32], index: 11, kind: output, shape index: {0}]   ;;  %s2797_s12 = inlined_call_operand.hbm [shape: f32[2,8,8], index: 12, kind: output, shape index: {1}]  }
   0x1   :  { %2814 = sst [smem:[#allocation34_spill]] %s2788_s3 }
   0x2   :  { %2815 = sst [smem:[#allocation35_spill]] %s2790_s5 }
   0x3   :  { %2816 = sst [smem:[#allocation36_spill]] %s2792_s7 }
   0x4   :  { %2817 = sst [smem:[#allocation37_spill]] %s2795_s10 }
   0x5   :  { %2818 = sst [smem:[#allocation38_spill]] %s2796_s11 }
   0x6   :  { %2819 = sst [smem:[#allocation39_spill]] %s2797_s12 }
   0x7   :  { %18 = vsyncpa [#allocation4], 0 }
   0x8   :  { %20 = vsyncpa [#allocation4 + $0x1], 0 }
   0x9   :  { %21 = vsyncpa [#allocation7], 0 }
   0xa   :  { %23 = vsyncpa [#allocation7 + $0x1], 0 }
   0xb   :  { %24 = vsyncpa [#allocation10], 0 }
   0xc   :  { %25 = vsyncpa [#allocation13], 0 }
   0xd   :  { %26 = vsyncpa [#allocation16], 0 }
   0xe   :  { %27 = vsyncpa [#allocation5], 0 }
   0xf   :  { %29 = vsyncpa [#allocation5 + $0x1], 0 }
  0x10   :  { %30 = vsyncpa [#allocation20], 0 }
  0x11   :  { %32 = vsyncpa [#allocation20 + $0x1], 0  ;;  %s2393_s21 = smov 0   ;;  %s2395_s22 = smov 0  }
  0x12   :  { %s2397_s23 = smov 0   ;;  %s2399_s24 = smov 0  }
  0x13   :  { %s2401_s25 = smov 0   ;;  %s2403_s26 = smov 0  }
  0x14 LB: > { %2820 = sst [smem:[#allocation28_spill]] %s2285_s21  ;;  %s2424_s27 = sadd.s32 4294967295, %s2305_s26   ;;  %s2305_s26 = sphi %s2403_s26, %s38_s26   ;;  %s2301_s25 = sphi %s2401_s25, %s2861_s25   ;;  %s2297_s24 = sphi %s2399_s24, %s2860_s24   ;;  %s2293_s23 = sphi %s2397_s23, %s2864_s23   ;;  %s2289_s22 = sphi %s2395_s22, %s2863_s22   ;;  %s2285_s21 = sphi %s2393_s21, %s2862_s21  }
  0x15   : > { %2821 = sst [smem:[#allocation29_spill]] %s2301_s25  ;;  %p1603_p0 = scmp.ge.s32.totalorder %s2305_s26, 1 }
  0x16   : > { %2822 = sst [smem:[#allocation30_spill]] %s2305_s26  ;;  %p2799_p1 = scmp.eq.s32.totalorder %s2424_s27, 0 }
  0x17   : > { %p359_p2 = scmp.lt.s32.totalorder %s2305_s26, 3  ;;  %s2307_s29 = smov [#allocation9]  }
  0x18   : > { %s371_s30 = sshll.u32 %s2307_s29, 4  ;;  %s2308_s14 = smov [#allocation12]   ;;  %s372_s30 = int_to_ptr.vmem [resolvable:$true] %s371_s30 }
  0x19   : > { %p2429_p3 = pnand %p1603_p0, %p359_p2  ;;  %s395_s15 = sshll.u32 %s2308_s14, 4  ;;  %s396_s15 = int_to_ptr.vmem [resolvable:$true] %s395_s15 }
  0x1a   : > { %s2309_s16 = smov [#allocation15]   ;;  %s1950_s19 = scalar_lea.vmem %s372_s30, 256 }
  0x1b   : > { %s2823_s28 = scalar_select %p2429_p3, 1, 0 }
  0x1c   : > { %p1801_p4 = pneg %p2429_p3  ;;  %s419_s17 = sshll.u32 %s2309_s16, 4  ;;  %s420_s17 = int_to_ptr.vmem [resolvable:$true] %s419_s17 }
  0x1d   : > { %p1951_p8 = scmp.ne.s32.totalorder %s372_s30, %s1950_s19  ;;  %p1958_p11 = scmp.lt.s32.totalorder %s372_s30, %s372_s30 }
  0x1e   : > { %p2438_p6 = pnand %p1801_p4, %p2799_p1  ;;  %p1959_p12 = scmp.lt.s32.totalorder %s1950_s19, %s1950_s19 }
  0x20   : > { %s2824_s13 = scalar_select %p2438_p6, 1, 0 }
  0x21   : > { %p2444_p7 = pneg %p2438_p6  ;;  %p1960_p13 = por %p1959_p12, %p1958_p11 }
  0x23   : > { %p1953_p9 = pnand %p1951_p8, %p2444_p7 }
  0x25   : > { %p1954_p10 = pneg %p1953_p9 }
  0x27   : > { %p1961_p0 = pnand %p1960_p13, %p1954_p10 }
  0x29   : > { %1964 = shalt.err (!%p1961_p0)
}
  0x2a   : > { %s2310_s20 = smov 64   ;;  %s2311_s29 = smov 4  }
  0x2b   : > { %s2826_s3 = sld [smem:[#allocation34_spill]]  ;;  %s1976_s11 = scalar_lea.vmem %s396_s15, 256 }
  0x2c   : > { %p1977_p2 = scmp.ne.s32.totalorder %s396_s15, %s1976_s11  ;;  %p1984_p9 = scmp.lt.s32.totalorder %s396_s15, %s396_s15 }
  0x2d   : > { %p1985_p5 = scmp.lt.s32.totalorder %s1976_s11, %s1976_s11 }
  0x2e   : > { %p1979_p4 = pnand %p1977_p2, %p2444_p7 }
  0x2f   : > { %p1986_p1 = por %p1985_p5, %p1984_p9 }
  0x30   : > { %p1980_p8 = pneg %p1979_p4 }
  0x31   : > { %1804 = dma.hbm_to_vmem [thread:$0]  (!%p2438_p6), %s2826_s3, 256, %s372_s30, [#allocation10], %s2310_s20, %s2310_s20, %s2311_s29  }
  0x32   : > { %p1987_p11 = pnand %p1986_p1, %p1980_p8 }
  0x34   : > { %1990 = shalt.err (!%p1987_p11)
}
  0x35   : > { %s2827_s5 = sld [smem:[#allocation35_spill]]  ;;  %s2002_s14 = scalar_lea.vmem %s420_s17, 256 }
  0x36   : > { %p2003_p10 = scmp.ne.s32.totalorder %s420_s17, %s2002_s14  ;;  %p2010_p0 = scmp.lt.s32.totalorder %s420_s17, %s420_s17 }
  0x37   : > { %p2011_p2 = scmp.lt.s32.totalorder %s2002_s14, %s2002_s14 }
  0x38   : > { %p2005_p12 = pnand %p2003_p10, %p2444_p7 }
  0x39   : > { %p2012_p4 = por %p2011_p2, %p2010_p0 }
  0x3a   : > { %p2006_p13 = pneg %p2005_p12 }
  0x3b   : > { %1810 = dma.hbm_to_vmem [thread:$0]  (!%p2438_p6), %s2827_s5, 256, %s396_s15, [#allocation13], %s2310_s20, %s2310_s20, %s2311_s29  }
  0x3c   : > { %p2013_p3 = pnand %p2012_p4, %p2006_p13 }
  0x3e   : > { %2016 = shalt.err (!%p2013_p3)
}
  0x3f   : > { %s2828_s7 = sld [smem:[#allocation36_spill]]  ;;  %s1602_s10 = sadd.s32 4294967294, %s2305_s26  }
  0x40   : > { %s50_s15 = sadd.s32 1, %s2301_s25  ;;  %s59_s16 = sadd.s32 1, %s2293_s23 }
  0x41   : > { %p52_p1 = scmp.ge.s32.totalorder %s50_s15, 2  ;;  %p66_p3 = scmp.ne.s32.totalorder %s2293_s23, %s2289_s22 }
  0x42   : > { %p67_p5 = scmp.eq.s32.totalorder %s2305_s26, 0  ;;  %p72_p8 = scmp.ne.s32.totalorder %s2289_s22, %s2285_s21 }
  0x43   : > { %s2866_s15 = smov (%p52_p1, %s50_s15), 0  ;;  %p2831_p11 = scmp.eq.s32.totalorder %s2424_s27, 0 }
  0x44   : > { %2829 = sst [smem:[#allocation31_spill]] %s2866_s15  ;;  %p2479_p9 = por %p67_p5, %p66_p3 }
  0x45   : > { %1816 = dma.hbm_to_vmem [thread:$0]  (!%p2438_p6), %s2828_s7, 256, %s420_s17, [#allocation16], %s2310_s20, %s2310_s20, %s2311_s29  }
  0x46   : > { %p2485_p10 = por %p2831_p11, %p72_p8  ;;  %s54_s20 = ssub.s32 %s2301_s25, %s2866_s15 }
  0x47   : > { %p318_p12 = scmp.eq.s32.totalorder %s2424_s27, 1  ;;  %p57_p13 = scmp.eq.s32.totalorder %s54_s20, 0 }
  0x48   : > { %s2832_s17 = scalar_select %p2485_p10, 1, 0 }
  0x49   : > { %p324_p0 = scmp.eq.s32.totalorder %s1602_s10, 1  ;;  %p2492_p2 = por %p318_p12, %p66_p3 }
  0x4a   : > { %p1843_p4 = scmp.lt.s32.totalorder %s2305_s26, 2  ;;  %s2803_s30 = sand.u32 1, %s2293_s23  }
  0x4b   : > { %s2833_s29 = scalar_select %p2492_p2, 1, 0 }
  0x4c   : > { %s2498_s14 = scalar_select %p57_p13, %s2293_s23, %s59_s16  }
  0x4d   : > { %p2500_p1 = por %p324_p0, %p72_p8  ;;  %s2507_s3 = sshll.u32 %s2803_s30, 3 }
  0x4e   : > { %2834 = sst [smem:[#allocation32_spill]] %s2498_s14  ;;  %s2510_s5 = sshll.u32 %s2301_s25, 7 }
  0x4f   : > { %s2835_s11 = scalar_select %p2500_p1, 1, 0 }
  0x50   : > { %p2514_p3 = pnand %p1843_p4, %p2479_p9  ;;  %s469_s16 = sand.u32 1, %s2305_s26  }
  0x51   : > { %2836 = sst [smem:[#allocation33_spill]] %s2835_s11  ;;  %s478_s15 = scalar_lea.hbm %s2786_s1, %s2510_s5 }
  0x52   : > { %s473_s14 = scalar_lea.vmem [#allocation6], %s2507_s3  ;;  %s2312_s30 = smov [#allocation11]  }
  0x53   : > { %s480_s11 = sshll.u32 %s473_s14, 4  ;;  %s385_s21 = sshll.u32 %s2312_s30, 4  ;;  %s481_s11 = int_to_ptr.vmem [resolvable:$true] %s480_s11  ;;  %s386_s21 = int_to_ptr.vmem [resolvable:$true] %s385_s21 }
  0x54   : > { %s2524_s25 = scalar_lea.sflag [#allocation7], %s469_s16  ;;  %p2809_p5 = pneg %p2514_p3 }
  0x55   : > { %s2030_s19 = scalar_lea.vmem %s481_s11, 128  ;;  %s2313_s26 = smov [#allocation6]  }
  0x56   : > { %p2031_p8 = scmp.ne.s32.totalorder %s481_s11, %s2030_s19  ;;  %s2035_s12 = sshll.u32 %s2313_s26, 4  ;;  %s2036_s12 = int_to_ptr.vmem [resolvable:$false] %s2035_s12 }
  0x57   : > { %s2037_s7 = scalar_lea.vmem %s2036_s12, 256  ;;  %p2038_p12 = scmp.lt.s32.totalorder %s481_s11, %s2036_s12 }
  0x58   : > { %p2033_p9 = pnand %p2031_p8, %p2809_p5  ;;  %p2039_p13 = scmp.lt.s32.totalorder %s2037_s7, %s2030_s19 }
  0x5a   : > { %p2034_p11 = pneg %p2033_p9  ;;  %p2040_p0 = por %p2039_p13, %p2038_p12 }
  0x5c   : > { %p2041_p4 = pnand %p2040_p0, %p2034_p11 }
  0x5e   : > { %2044 = shalt.err (!%p2041_p4)
}
  0x5f   : > { %1826 = dma.hbm_to_vmem [thread:$0]  (!%p2514_p3), %s478_s15, 128, %s481_s11, %s2524_s25  }
  0x60   : > { %s2056_s14 = scalar_lea.vmem %s386_s21, 16  ;;  %s2063_s30 = scalar_lea.vmem %s386_s21, 32 }
  0x61   : > { %p2057_p1 = scmp.ne.s32.totalorder %s386_s21, %s2056_s14  ;;  %p2064_p5 = scmp.lt.s32.totalorder %s386_s21, %s386_s21 }
  0x62   : > { %p2065_p2 = scmp.lt.s32.totalorder %s2063_s30, %s2056_s14 }
  0x63   : > { %p2059_p8 = pnand %p2057_p1, %p2444_p7 }
  0x64   : > { %p2066_p10 = por %p2065_p2, %p2064_p5 }
  0x65   : > { %p2060_p9 = pneg %p2059_p8 }
  0x67   : > { %p2067_p6 = pnand %p2066_p10, %p2060_p9 }
  0x69   : > { %2070 = shalt.err (!%p2067_p6)
}
  0x6a   : > { %p2838_p11 = scmp.ne.s32.totalorder %s2824_s13, 0  ;;  %s2314_s15 = smov [#allocation14]  }
  0x6b   : > { %s409_s11 = sshll.u32 %s2314_s15, 4  ;;  %s2315_s16 = smov [#allocation17]   ;;  %s410_s11 = int_to_ptr.vmem [resolvable:$true] %s409_s11 }
  0x6c   : > { %1807 = dma.hbm_to_vmem [thread:$0]  (!%p2838_p11), %s2789_s4, 16, %s386_s21, [#allocation10]  }
  0x6d   : > { %s433_s20 = sshll.u32 %s2315_s16, 4  ;;  %s2082_s19 = scalar_lea.vmem %s410_s11, 16  ;;  %s434_s20 = int_to_ptr.vmem [resolvable:$true] %s433_s20 }
  0x6e   : > { %p2083_p1 = scmp.ne.s32.totalorder %s410_s11, %s2082_s19  ;;  %s2089_s7 = scalar_lea.vmem %s410_s11, 32 }
  0x6f   : > { %p2090_p10 = scmp.lt.s32.totalorder %s410_s11, %s410_s11  ;;  %p2091_p6 = scmp.lt.s32.totalorder %s2089_s7, %s2082_s19 }
  0x70   : > { %p2085_p12 = pnand %p2083_p1, %p2444_p7 }
  0x71   : > { %p2092_p2 = por %p2091_p6, %p2090_p10 }
  0x72   : > { %p2086_p13 = pneg %p2085_p12 }
  0x74   : > { %p2093_p5 = pnand %p2092_p2, %p2086_p13 }
  0x76   : > { %2096 = shalt.err (!%p2093_p5)
}
  0x77   : > { %1813 = dma.hbm_to_vmem [thread:$0]  (!%p2838_p11), %s2791_s6, 16, %s410_s11, [#allocation13]  }
  0x78   : > { %s2108_s30 = scalar_lea.vmem %s434_s20, 16  ;;  %s2115_s12 = scalar_lea.vmem %s434_s20, 32 }
  0x79   : > { %p2109_p0 = scmp.ne.s32.totalorder %s434_s20, %s2108_s30  ;;  %p2116_p9 = scmp.lt.s32.totalorder %s434_s20, %s434_s20 }
  0x7a   : > { %p2117_p1 = scmp.lt.s32.totalorder %s2115_s12, %s2108_s30 }
  0x7b   : > { %p2111_p4 = pnand %p2109_p0, %p2444_p7 }
  0x7c   : > { %p2118_p12 = por %p2117_p1, %p2116_p9 }
  0x7d   : > { %p2112_p8 = pneg %p2111_p4 }
  0x7f   : > { %p2119_p10 = pnand %p2118_p12, %p2112_p8 }
  0x81   : > { %2122 = shalt.err (!%p2119_p10)
}
  0x82   : > { %1819 = dma.hbm_to_vmem [thread:$0]  (!%p2838_p11), %s2793_s8, 16, %s434_s20, [#allocation16]  }
  0x83   : > { %s460_s16 = scalar_lea.hbm %s2785_s0, %s2510_s5  ;;  %s454_s19 = scalar_lea.vmem [#allocation3], %s2507_s3 }
  0x84   : > { %s462_s7 = sshll.u32 %s454_s19, 4  ;;  %s496_s13 = scalar_lea.hbm %s2787_s2, %s2510_s5  ;;  %s463_s7 = int_to_ptr.vmem [resolvable:$true] %s462_s7 }
  0x85   : > { %s2839_s30 = sand.u32 1, %s2293_s23   ;;  %s2136_s26 = scalar_lea.vmem %s463_s7, 128 }
  0x86   : > { %s451_s12 = scalar_lea.sflag [#allocation4], %s2839_s30  ;;  %p2137_p7 = scmp.ne.s32.totalorder %s463_s7, %s2136_s26 }
  0x87   : > { %p2840_p13 = pneg %p2514_p3  ;;  %s2316_s20 = smov [#allocation3]  }
  0x88   : > { %s2141_s15 = sshll.u32 %s2316_s20, 4  ;;  %s2142_s15 = int_to_ptr.vmem [resolvable:$false] %s2141_s15 }
  0x89   : > { %p2139_p6 = pnand %p2137_p7, %p2840_p13  ;;  %s2143_s18 = scalar_lea.vmem %s2142_s15, 256 }
  0x8a   : > { %p2144_p11 = scmp.lt.s32.totalorder %s463_s7, %s2142_s15  ;;  %p2145_p5 = scmp.lt.s32.totalorder %s2143_s18, %s2136_s26 }
  0x8b   : > { %p2140_p2 = pneg %p2139_p6 }
  0x8c   : > { %p2146_p0 = por %p2145_p5, %p2144_p11 }
  0x8e   : > { %p2147_p4 = pnand %p2146_p0, %p2140_p2 }
  0x90   : > { %2150 = shalt.err (!%p2147_p4)
}
  0x91   : > { %1823 = dma.hbm_to_vmem [thread:$0]  (!%p2514_p3), %s460_s16, 128, %s463_s7, %s451_s12  }
  0x92   : > { %s491_s11 = scalar_lea.vmem [#allocation8], %s2507_s3  ;;  %p2841_p9 = pmov %p2840_p13 }
  0x93   : > { %s498_s19 = sshll.u32 %s491_s11, 4  ;;  %s2317_s21 = smov [#allocation8]   ;;  %s499_s19 = int_to_ptr.vmem [resolvable:$true] %s498_s19 }
  0x94   : > { %s2164_s14 = scalar_lea.vmem %s499_s19, 128  ;;  %s2169_s30 = sshll.u32 %s2317_s21, 4  ;;  %s2170_s30 = int_to_ptr.vmem [resolvable:$false] %s2169_s30 }
  0x95   : > { %p2165_p8 = scmp.ne.s32.totalorder %s499_s19, %s2164_s14  ;;  %s2171_s26 = scalar_lea.vmem %s2170_s30, 256 }
  0x96   : > { %p2172_p10 = scmp.lt.s32.totalorder %s499_s19, %s2170_s30  ;;  %p2173_p7 = scmp.lt.s32.totalorder %s2171_s26, %s2164_s14 }
  0x97   : > { %p2167_p1 = pnand %p2165_p8, %p2841_p9 }
  0x98   : > { %p2174_p13 = por %p2173_p7, %p2172_p10 }
  0x99   : > { %p2168_p12 = pneg %p2167_p1 }
  0x9b   : > { %p2175_p6 = pnand %p2174_p13, %p2168_p12 }
  0x9d   : > { %2178 = shalt.err (!%p2175_p6)
}
  0x9e   : > { %1829 = dma.hbm_to_vmem [thread:$0]  (!%p2514_p3), %s496_s13, 128, %s499_s19, %s2524_s25  }
  0x9f   : > { %p2842_p2 = scmp.ne.s32.totalorder %s2823_s28, 0 }
  0xa0   : > { %s2586_s7 = sand.u32 (!%p2842_p2), 1, %s2289_s22   ;;  %p2843_p11 = scmp.ne.s32.totalorder (!%p2842_p2), %s2832_s17, 0 }
  0xa1   : > { %507 = sbr.rel (%p2842_p2) target bundleno = 1559 (0x617), region = 64  ;;  %s2589_s12 = sshll.u32 (!%p2842_p2), %s2586_s7, 3 }
  0xa2   : > { %s510_s10 = scalar_lea.sflag (!%p2842_p2), [#allocation4], %s2586_s7  ;;  %s513_s20 = scalar_lea.vmem (!%p2842_p2), [#allocation3], %s2589_s12 }
  0xa6   : > { %2256 = dma.done.wait (%p2843_p11), %s510_s10, 128  }
  0xa7   : > { %2258 = vsyncadd (%p2843_p11), %s510_s10, 4294967168  ;;  %s518_s5 = sand.u32 1, %s2424_s27   ;;  %s522_s28 = scalar_lea.vmem [#allocation6], %s2589_s12 }
  0xa8   : > { %s519_s25 = scalar_lea.sflag [#allocation7], %s518_s5 }
  0xa9   : > { %2260 = dma.done.wait (%p2843_p11), %s519_s25, 256  }
  0xaa   : > { %2262 = vsyncadd (%p2843_p11), %s519_s25, 4294967040  ;;  %s531_s13 = scalar_lea.vmem [#allocation8], %s2589_s12  ;;  %p2844_p3 = scmp.eq.s32.totalorder %s2424_s27, 0 }
  0xac   : > { %2264 = dma.done.wait (%p2844_p3), [#allocation10], 272   ;;  %p2845_p5 = pmov %p2844_p3 }
  0xad   : > { %p2846_p0 = pmov %p2844_p3 }
  0xae   : > { %2266 = vsyncadd (%p2845_p5), [#allocation10], 4294967024 }
  0xaf   : > { %2268 = dma.done.wait (%p2846_p0), [#allocation13], 272   ;;  %p2847_p4 = pmov %p2846_p0 }
  0xb0   : > { %p2848_p8 = pmov %p2846_p0 }
  0xb1   : > { %2270 = vsyncadd (%p2847_p4), [#allocation13], 4294967024 }
  0xb2   : > { %2272 = dma.done.wait (%p2848_p8), [#allocation16], 272   ;;  %p2849_p9 = pmov %p2846_p0 }
  0xb3   : > { %v2318_v0 = vmov 0.0   ;;  %vm2319_vm0 = vmmov 0   ;;  %v1915_v1 = vld [vmem:[#allocation9 + $0x8] sm:$0xff]   ;;  %v1916_v2 = vld [vmem:[#allocation12 + $0x8] sm:$0xff]   ;;  %v1918_v4 = vld [vmem:[#allocation12] sm:$0xff]   ;;  %vm641_vm1 = vcmask 261120  }
  0xb4   : > { %2274 = vsyncadd (%p2849_p9), [#allocation16], 4294967024  ;;  %1687 = vmatprep.subr.bf16.mxu0 %v2318_v0  ;;  %1695 = vmatprep.subr.bf16.mxu1 %v2318_v0  ;;  %v1917_v3 = vld [vmem:[#allocation9] sm:$0xff]   ;;  %v612_v5 = vld [vmem:[%s513_s20] sm:$0xff]  ;;  %vm821_vm2 = vcmask 64512   ;;  %s2320_s27 = smov 112  }
  0xb5   : > { %1691 = vmatprep.mubr.msk.bf16.mxu0 %vm2319_vm0, %v2318_v0  ;;  %1699 = vmatprep.mubr.msk.bf16.mxu1 %vm2319_vm0, %v2318_v0  ;;  %v614_v6 = vld [vmem:[%s522_s28] sm:$0xff]  ;;  %v613_v7 = vpack.c.bf16 %v612_v5, %v612_v5  ;;  %v1629_v9 = vld [vmem:[#allocation11] ss:$0 sm:$0xff]  ;;  %s2321_s17 = smov 120   ;;  %s2322_s15 = smov 104   ;;  %vm884_vm3 = vcmask 1043456  }
  0xb6   : > { %1688 = vmatpush3.bf16.msra.mxu0 %v1915_v1  ;;  %1696 = vmatpush3.bf16.msra.mxu1 %v1916_v2  ;;  %v615_v8 = vpack.c.bf16 %v614_v6, %v614_v6  ;;  %v1633_v10 = vld [vmem:[#allocation14] ss:$0 sm:$0xff]  ;;  %v1919_v25 = vld [vmem:[#allocation15 + $0x8] sm:$0xff]   ;;  %v1920_v26 = vld [vmem:[#allocation15] sm:$0xff]   ;;  %s610_s18 = scalar_lea.vmem [#allocation19], %s2589_s12  ;;  %s2323_s11 = smov 8  }
  0xb7   : > { %1689 = vmatprep.subr.bf16.mxu0 %v2318_v0  ;;  %1697 = vmatprep.subr.bf16.mxu1 %v2318_v0  ;;  %v616_v27 = vld [vmem:[%s531_s13] sm:$0xff]  ;;  %s2324_s26 = smov 16   ;;  %s2325_s3 = smov 24   ;;  %vm1047_vm4 = vcmask 130112   ;;  %vm1164_vm5 = vcmask 195712   ;;  %vm1281_vm6 = vcmask 261312  }
  0xb8   : > { %v617_v28 = vpack.c.bf16 %v616_v27, %v616_v27  ;;  %v1637_v43 = vld [vmem:[#allocation17] ss:$0 sm:$0xff]  ;;  %s1655_s16 = sshll.u32 %s2297_s24, 7  ;;  %s2850_s5 = sld [smem:[#allocation39_spill]] }
  0xb9   : > { %s1388_s28 = sshll.u32 %s610_s18, 4  ;;  %s1360_s13 = scalar_lea.sflag [#allocation20], %s2586_s7  ;;  %s1389_s28 = int_to_ptr.vmem [resolvable:$true] %s1388_s28 }
  0xba   : > { %1690 = vmatpush3.bf16.msra.mxu0 %v1917_v3  ;;  %1698 = vmatpush3.bf16.msra.mxu1 %v1918_v4  ;;  %p2851_p12 = scmp.ne.s32.totalorder %s2833_s29, 0 }
  0xbb   : > { %1703 = vmatprep.subr.bf16.mxu0 %v2318_v0  ;;  %1711 = vmatprep.subr.bf16.mxu1 %v2318_v0 }
  0xbd   : > { %1692 = vmatmul.mubr.msk.bf16.vlgmr.msra.gmra.mxu0 %vm641_vm1, %v613_v7  ;;  %1700 = vmatmul.mubr.msk.bf16.vlgmr.msra.gmra.mxu1 %vm641_vm1, %v615_v8 }
  0xbe   : > { %1707 = vmatprep.mubr.msk.bf16.mxu0 %vm2319_vm0, %v2318_v0  ;;  %1713 = vmatprep.mubr.msk.bf16.mxu1 %vm2319_vm0, %v2318_v0  ;;  %s1386_s25 = scalar_lea.hbm %s2850_s5, %s1655_s16 }
  0xbf   : > { %1704 = vmatpush3.bf16.msra.mxu0 %v1919_v25 }
  0xc0   : > { %1705 = vmatprep.subr.bf16.mxu0 %v2318_v0 }
  0xc3   : > { %1706 = vmatpush3.bf16.msra.mxu0 %v1920_v26 }
  0xc4   : > { %1717 = vmatprep.subr.bf16.mxu0 %v2318_v0 }
  0xc6   : > { %1708 = vmatmul.mubr.msk.bf16.vlgmr.msra.gmra.mxu0 %vm641_vm1, %v617_v28 }
  0xc7   : > { %1719 = vmatprep.mubr.msk.bf16.mxu0 %vm2319_vm0, %v2318_v0 }
 0x17d   : > { %v679_v11 = vpop.f32.mrf.mxu0  ;;  %v745_v13 = vpop.f32.mrf.mxu1 }
 0x17e   : > { %v680_v12 = vadd.f32 %v1629_v9, %v679_v11  ;;  %v746_v14 = vadd.f32 %v1633_v10, %v745_v13 }
 0x17f   : > { %v1693_v15 = vpop.f32.mrf.mxu0  ;;  %v1701_v17 = vpop.f32.mrf.mxu1 }
 0x180   : > { %v817_v16 = vmul.f32 0.35355338, %v680_v12  ;;  %v819_v18 = vpack.c.bf16 %v746_v14, %v746_v14 }
 0x181   : > { %v682_v19 = vpop.f32.mrf.mxu0  ;;  %v748_v20 = vpop.f32.mrf.mxu1 }
 0x182   : > { %v818_v21 = vpack.c.bf16 %v817_v16, %v817_v16  ;;  %1051 = vrot.lane.b32.xlu1 %v819_v18, %s2320_s27  ;;  %933 = vrot.lane.b32.xlu0 %v819_v18, %s2321_s17  ;;  %v826_v23 = vsel %vm821_vm2, %v819_v18, 0 }
 0x183   : > { %v1694_v22 = vpop.f32.mrf.mxu0  ;;  %v1702_v24 = vpop.f32.mrf.mxu1  ;;  %1712 = vmatpush3.bf16.xpose.msra.mxu1 %v826_v23 }
 0x184   : > { %1723 = vmatprep.subr.bf16.mxu1 %v2318_v0 }
 0x186   : > { %1049 = vrot.lane.b32.xlu1 %v818_v21, %s2320_s27  ;;  %930 = vrot.lane.b32.xlu0 %v818_v21, %s2321_s17  ;;  %v811_v44 = vpop.f32.mrf.mxu0 }
 0x187   : > { %v812_v45 = vadd.f32 %v1637_v43, %v811_v44 }
 0x188   : > { %v1709_v46 = vpop.f32.mrf.mxu0 }
 0x189   : > { %v820_v47 = vpack.c.bf16 %v812_v45, %v812_v45 }
 0x18a   : > { %1166 = vrot.lane.b32.xlu1 %v818_v21, %s2322_s15  ;;  %1168 = vrot.lane.b32.xlu0 %v819_v18, %s2322_s15  ;;  %v814_v48 = vpop.f32.mrf.mxu0 }
 0x18b   : > { %1714 = vmatmul.mubr.msk.bf16.vlgmr.msra.gmra.mxu1 %vm821_vm2, %v818_v21  ;;  %v886_v49 = vsel %vm884_vm3, %v820_v47, 0 }
 0x18c   : > { %1725 = vmatprep.mubr.msk.bf16.mxu1 %vm2319_vm0, %v2318_v0  ;;  %v1710_v50 = vpop.f32.mrf.mxu0  ;;  %1718 = vmatpush3.bf16.msra.mxu0 %v886_v49 }
 0x18d   : > { %1729 = vmatprep.subr.bf16.mxu0 %v2318_v0 }
 0x1f4   : > { %v934_v29 = vpop.permute.xlu0 %933  ;;  %v1052_v31 = vpop.permute.xlu1 %1051 }
 0x1f5   : > { %v939_v30 = vsel %vm821_vm2, %v934_v29, 0  ;;  %v1057_v33 = vsel %vm821_vm2, %v1052_v31, 0 }
 0x1f6   : > { %1724 = vmatpush3.bf16.xpose.msra.mxu1 %v939_v30 }
 0x1f7   : > { %1735 = vmatprep.subr.bf16.mxu1 %v2318_v0 }
 0x1f8   : > { %v931_v32 = vpop.permute.xlu0 %930  ;;  %v1050_v35 = vpop.permute.xlu1 %1049 }
 0x1fc   : > { %v1169_v34 = vpop.permute.xlu0 %1168  ;;  %v1167_v37 = vpop.permute.xlu1 %1166 }
 0x1fd   : > { %1726 = vmatmul.mubr.msk.bf16.vlgmr.msra.gmra.mxu1 %vm821_vm2, %v931_v32  ;;  %v1174_v36 = vsel %vm821_vm2, %v1169_v34, 0 }
 0x1fe   : > { %1736 = vmatpush3.bf16.xpose.msra.mxu1 %v1057_v33  ;;  %1737 = vmatprep.mubr.msk.bf16.mxu1 %vm2319_vm0, %v2318_v0 }
 0x1ff   : > { %1747 = vmatprep.subr.bf16.mxu1 %v2318_v0 }
 0x205   : > { %1738 = vmatmul.mubr.msk.bf16.vlgmr.msra.gmra.mxu1 %vm821_vm2, %v1050_v35 }
 0x206   : > { %1748 = vmatpush3.bf16.xpose.msra.mxu1 %v1174_v36  ;;  %1749 = vmatprep.mubr.msk.bf16.mxu1 %vm2319_vm0, %v2318_v0 }
 0x207   : > { %1759 = vmatprep.subr.bf16.mxu1 %v2318_v0 }
 0x20d   : > { %1750 = vmatmul.mubr.msk.bf16.vlgmr.msra.gmra.mxu1 %vm821_vm2, %v1167_v37 }
 0x20e   : > { %1763 = vmatprep.mubr.msk.bf16.mxu1 %vm2319_vm0, %v2318_v0 }
 0x24b   : > { %v862_v38 = vpop.f32.mrf.mxu1 }
 0x24c   : > { %v868_v39 = vsel %vm821_vm2, %v862_v38, -inf }
 0x24d   : > { %869 = vmax.xlane.f32.xlu0 %v868_v39  ;;  %v1715_v40 = vpop.f32.mrf.mxu1 }
 0x24f   : > { %v865_v41 = vpop.f32.mrf.mxu1 }
 0x251   : > { %v1716_v42 = vpop.f32.mrf.mxu1 }
 0x2bd   : > { %v975_v51 = vpop.f32.mrf.mxu1 }
 0x2be   : > { %v981_v52 = vsel %vm821_vm2, %v975_v51, -inf }
 0x2bf   : > { %982 = vmax.xlane.f32.xlu1 %v981_v52  ;;  %v1727_v53 = vpop.f32.mrf.mxu1 }
 0x2c1   : > { %v978_v54 = vpop.f32.mrf.mxu1 }
 0x2c3   : > { %v1728_v55 = vpop.f32.mrf.mxu1 }
 0x2c5   : > { %v1093_v56 = vpop.f32.mrf.mxu1 }
 0x2c6   : > { %v1099_v57 = vsel %vm821_vm2, %v1093_v56, -inf }
 0x2c7   : > { %1100 = vmax.xlane.f32.xlu0 %v1099_v57  ;;  %v1739_v58 = vpop.f32.mrf.mxu1 }
 0x2c8   : > { %v1922_v58 = vld [vmem:[%s2794_s9] sm:$0xff]  }
 0x2c9   : > { %v1096_v59 = vpop.f32.mrf.mxu1 }
 0x2cb   : > { %v1740_v60 = vpop.f32.mrf.mxu1 }
 0x2cd   : > { %v1210_v61 = vpop.f32.mrf.mxu1 }
 0x2ce   : > { %v1216_v62 = vsel %vm821_vm2, %v1210_v61, -inf }
 0x2cf   : > { %1217 = vmax.xlane.f32.xlu0 %v1216_v62  ;;  %v1751_v63 = vpop.f32.mrf.mxu1 }
 0x2d1   : > { %v1213_v1 = vpop.f32.mrf.mxu1 }
 0x2d3   : > { %v1752_v2 = vpop.f32.mrf.mxu1 }
 0x2d6   : > { %v870_v3 = vpop.xlane.xlu0 %869 }
 0x2d7   : > { %v871_v4 = vsub.f32 %v862_v38, %v870_v3 }
 0x2d9   : > { %v872_v5 = vmul.f32 1.442695, %v871_v4 }
 0x2db   : > { %1923 = vpow2.f32 %v872_v5 }
 0x2e8   : > { %v1924_v6 = vpop.eup %1923 }
 0x2e9   : > { %v874_v7 = vsel %vm821_vm2, %v1924_v6, 0.0 }
 0x2ea   : > { %875 = vadd.xlane.f32.xlu1 %v874_v7 }
 0x2fb   : > { %995 = vrot.lane.b32.xlu1 %v820_v47, %s2321_s17  ;;  %s2326_s17 = smov [#allocation19]  }
 0x348   : > { %v983_v8 = vpop.xlane.xlu1 %982 }
 0x349   : > { %v984_v9 = vsub.f32 %v975_v51, %v983_v8 }
 0x34b   : > { %v985_v10 = vmul.f32 1.442695, %v984_v9 }
 0x34d   : > { %1925 = vpow2.f32 %v985_v10 }
 0x350   : > { %v1101_v11 = vpop.xlane.xlu0 %1100 }
 0x351   : > { %v1102_v12 = vsub.f32 %v1093_v56, %v1101_v11  ;;  %v1921_v56 = vld [vmem:[%s2794_s9 + $0x8] sm:$0xff]  }
 0x352   : > { %1760 = vmatpush3.bf16.msra.mxu1 %v1921_v56 }
 0x353   : > { %v1103_v13 = vmul.f32 1.442695, %v1102_v12  ;;  %1761 = vmatprep.subr.bf16.mxu1 %v2318_v0 }
 0x355   : > { %1927 = vpow2.f32 %v1103_v13 }
 0x356   : > { %1762 = vmatpush3.bf16.msra.mxu1 %v1922_v58 }
 0x358   : > { %v1218_v14 = vpop.xlane.xlu0 %1217 }
 0x359   : > { %v1219_v15 = vsub.f32 %v1210_v61, %v1218_v14 }
 0x35a   : > { %v1926_v16 = vpop.eup %1925 }
 0x35b   : > { %v1220_v17 = vmul.f32 1.442695, %v1219_v15  ;;  %v987_v18 = vsel %vm821_vm2, %v1926_v16, 0.0 }
 0x35c   : > { %988 = vadd.xlane.f32.xlu0 %v987_v18 }
 0x35d   : > { %1929 = vpow2.f32 %v1220_v17 }
 0x362   : > { %v1928_v19 = vpop.eup %1927 }
 0x363   : > { %v1105_v20 = vsel %vm821_vm2, %v1928_v19, 0.0 }
 0x364   : > { %1106 = vadd.xlane.f32.xlu1 %v1105_v20 }
 0x36a   : > { %v1930_v21 = vpop.eup %1929 }
 0x36b   : > { %v1222_v22 = vsel %vm821_vm2, %v1930_v21, 0.0 }
 0x36c   : > { %1223 = vadd.xlane.f32.xlu0 %v1222_v22 }
 0x373   : > { %v876_v23 = vpop.xlane.xlu1 %875 }
 0x374   : > { %1931 = vrcp.f32 %v876_v23 }
 0x375   : > { %1229 = vrot.lane.b32.xlu1 %v820_v47, %s2322_s15  ;;  %s2183_s15 = sshll.u32 %s2326_s17, 4  ;;  %s2184_s15 = int_to_ptr.vmem [resolvable:$false] %s2183_s15 }
 0x376   : > { %p2186_p13 = scmp.lt.s32.totalorder %s1389_s28, %s2184_s15 }
 0x377   : > { %v996_v25 = vpop.permute.xlu1 %995 }
 0x378   : > { %v1001_v28 = vsel %vm884_vm3, %v996_v25, 0 }
 0x381   : > { %v1932_v24 = vpop.eup %1931 }
 0x382   : > { %1112 = vrot.lane.b32.xlu0 %v820_v47, %s2320_s27  ;;  %v878_v26 = vmul.f32 %v1932_v24, %v1924_v6  ;;  %s2179_s27 = scalar_lea.vmem %s1389_s28, 128 }
 0x383   : > { %p2180_p1 = scmp.ne.s32.totalorder %s1389_s28, %s2179_s27 }
 0x384   : > { %v880_v27 = vpack.c.bf16 %v878_v26, %v878_v26 }
 0x385   : > { %p2181_p10 = pnand %p2180_p1, %p2851_p12 }
 0x386   : > { %1720 = vmatmul.mubr.msk.bf16.vlgmr.msra.gmra.mxu0 %vm821_vm2, %v880_v27 }
 0x387   : > { %1730 = vmatpush3.bf16.msra.mxu0 %v1001_v28  ;;  %1731 = vmatprep.mubr.msk.bf16.mxu0 %vm2319_vm0, %v2318_v0  ;;  %p2182_p7 = pneg %p2181_p10 }
 0x388   : > { %1741 = vmatprep.subr.bf16.mxu0 %v2318_v0 }
 0x3e5   : > { %v989_v29 = vpop.xlane.xlu0 %988 }
 0x3e6   : > { %1933 = vrcp.f32 %v989_v29 }
 0x3ed   : > { %v1107_v30 = vpop.xlane.xlu1 %1106 }
 0x3ee   : > { %1935 = vrcp.f32 %v1107_v30 }
 0x3f1   : > { %v1230_v39 = vpop.permute.xlu1 %1229 }
 0x3f2   : > { %v1235_v41 = vsel %vm884_vm3, %v1230_v39, 0 }
 0x3f3   : > { %v1934_v31 = vpop.eup %1933 }
 0x3f4   : > { %v991_v32 = vmul.f32 %v1934_v31, %v1926_v16 }
 0x3f5   : > { %v1224_v33 = vpop.xlane.xlu0 %1223 }
 0x3f6   : > { %1937 = vrcp.f32 %v1224_v33  ;;  %v993_v34 = vpack.c.bf16 %v991_v32, %v991_v32  ;;  %v992_v42 = vadd.f32 %v991_v32, %v878_v26 }
 0x3f8   : > { %1732 = vmatmul.mubr.msk.bf16.vlgmr.msra.gmra.mxu0 %vm821_vm2, %v993_v34 }
 0x3f9   : > { %v1113_v35 = vpop.permute.xlu0 %1112  ;;  %1743 = vmatprep.mubr.msk.bf16.mxu0 %vm2319_vm0, %v2318_v0 }
 0x3fa   : > { %v1118_v36 = vsel %vm884_vm3, %v1113_v35, 0 }
 0x3fb   : > { %v1936_v37 = vpop.eup %1935  ;;  %1742 = vmatpush3.bf16.msra.mxu0 %v1118_v36 }
 0x3fc   : > { %1753 = vmatprep.subr.bf16.mxu0 %v2318_v0  ;;  %v1109_v38 = vmul.f32 %v1936_v37, %v1928_v19 }
 0x3fe   : > { %v1111_v40 = vpack.c.bf16 %v1109_v38, %v1109_v38  ;;  %v1110_v44 = vadd.f32 %v1109_v38, %v992_v42 }
 0x400   : > { %1744 = vmatmul.mubr.msk.bf16.vlgmr.msra.gmra.mxu0 %vm821_vm2, %v1111_v40 }
 0x401   : > { %1754 = vmatpush3.bf16.msra.mxu0 %v1235_v41  ;;  %1755 = vmatprep.mubr.msk.bf16.mxu0 %vm2319_vm0, %v2318_v0 }
 0x403   : > { %v1938_v43 = vpop.eup %1937 }
 0x404   : > { %v1226_v45 = vmul.f32 %v1938_v43, %v1930_v21 }
 0x406   : > { %v1228_v46 = vpack.c.bf16 %v1226_v45, %v1226_v45  ;;  %v1227_v47 = vadd.f32 %v1226_v45, %v1110_v44 }
 0x408   : > { %1756 = vmatmul.mubr.msk.bf16.vlgmr.msra.gmra.mxu0 %vm821_vm2, %v1228_v46  ;;  %v1352_v48 = vmul.f32 0.25, %v1227_v47 }
 0x40a   : > { %1353 = vst.msk [vmem:[%s610_s18] sm:$0xff] %vm821_vm2, %v1352_v48 }
 0x446   : > { %v922_v49 = vpop.f32.mrf.mxu0 }
 0x447   : > { %928 = vst.msk [vmem:[#allocation2] sm:$0xff] %vm821_vm2, %v922_v49 }
 0x448   : > { %v1721_v50 = vpop.f32.mrf.mxu0 }
 0x44a   : > { %v925_v51 = vpop.f32.mrf.mxu0 }
 0x44c   : > { %v1722_v52 = vpop.f32.mrf.mxu0 }
 0x4b8   : > { %v1037_v53 = vpop.f32.mrf.mxu0 }
 0x4b9   : > { %1044 = vrot.lane.b32.xlu1 %v1037_v53, %s2323_s11  ;;  %s2185_s11 = scalar_lea.vmem %s2184_s15, 256 }
 0x4ba   : > { %v1733_v54 = vpop.f32.mrf.mxu0  ;;  %p2187_p6 = scmp.lt.s32.totalorder %s2185_s11, %s2179_s27 }
 0x4bc   : > { %v1040_v55 = vpop.f32.mrf.mxu0  ;;  %p2188_p2 = por %p2187_p6, %p2186_p13 }
 0x4be   : > { %v1734_v57 = vpop.f32.mrf.mxu0  ;;  %p2189_p11 = pnand %p2188_p2, %p2182_p7 }
 0x4c0   : > { %v1154_v59 = vpop.f32.mrf.mxu0 }
 0x4c1   : > { %1161 = vrot.lane.b32.xlu0 %v1154_v59, %s2324_s26 }
 0x4c2   : > { %v1745_v60 = vpop.f32.mrf.mxu0 }
 0x4c4   : > { %v1157_v61 = vpop.f32.mrf.mxu0 }
 0x4c6   : > { %v1746_v62 = vpop.f32.mrf.mxu0 }
 0x4c8   : > { %v1271_v63 = vpop.f32.mrf.mxu0 }
 0x4c9   : > { %1278 = vrot.lane.b32.xlu1 %v1271_v63, %s2325_s3 }
 0x4ca   : > { %v1757_v1 = vpop.f32.mrf.mxu0 }
 0x4cc   : > { %v1274_v2 = vpop.f32.mrf.mxu0 }
 0x4ce   : > { %v1758_v3 = vpop.f32.mrf.mxu0 }
 0x52b   : > { %v1045_v4 = vpop.permute.xlu1 %1044 }
 0x52c   : > { %1048 = vst.msk [vmem:[#allocation2] sm:$0xff] %vm1047_vm4, %v1045_v4 }
 0x533   : > { %v1162_v0 = vpop.permute.xlu0 %1161 }
 0x534   : > { %1165 = vst.msk [vmem:[#allocation2] sm:$0xff] %vm1164_vm5, %v1162_v0 }
 0x53b   : > { %v1279_v5 = vpop.permute.xlu1 %1278 }
 0x53c   : > { %1282 = vst.msk [vmem:[#allocation2] sm:$0xff] %vm1281_vm6, %v1279_v5 }
 0x543   : > { %v1283_v6 = vld [vmem:[#allocation2] sm:$0xff] }
 0x544   : > { %v1284_v7 = vpack.c.bf16 %v1283_v6, %v1283_v6 }
 0x546   : > { %1764 = vmatmul.mubr.msk.bf16.vlgmr.msra.gmra.mxu1 %vm641_vm1, %v1284_v7 }
 0x547   : > { %2192 = shalt.err (!%p2189_p11)
}
 0x548   : > { %s2193_s19 = scalar_lea.hbm %s1386_s25, 128  ;;  %s2197_s21 = scalar_lea.hbm %s2850_s5, 256 }
 0x549   : > { %p2194_p3 = scmp.ne.s32.totalorder %s1386_s25, %s2193_s19  ;;  %p2198_p4 = scmp.lt.s32.totalorder %s1386_s25, %s2850_s5 }
 0x54a   : > { %p2199_p8 = scmp.lt.s32.totalorder %s2197_s21, %s2193_s19 }
 0x54b   : > { %p2195_p5 = pnand %p2194_p3, %p2851_p12 }
 0x54c   : > { %p2200_p9 = por %p2199_p8, %p2198_p4 }
 0x54d   : > { %p2196_p0 = pneg %p2195_p5 }
 0x54f   : > { %p2201_p1 = pnand %p2200_p9, %p2196_p0 }
 0x551   : > { %2204 = shalt.err (!%p2201_p1)
}
 0x552   : > { %1798 = dma.vmem_to_hbm [thread:$0]  (%p2851_p12), %s1389_s28, 128, %s1386_s25, %s1360_s13  }
 0x553   : > { %s2852_s20 = sld [smem:[#allocation37_spill]]  ;;  %s603_s27 = scalar_lea.vmem [#allocation18], %s2589_s12 }
 0x554   : > { %s1374_s17 = sshll.u32 %s603_s27, 4  ;;  %s2853_s19 = sld [smem:[#allocation38_spill]]  ;;  %s2738_s17 = int_to_ptr.vmem [resolvable:$true] %s1374_s17 }
 0x555   : > { %s1355_s25 = scalar_lea.sflag [#allocation5], %s2586_s7  ;;  %s2205_s12 = scalar_lea.vmem %s2738_s17, 128 }
 0x556   : > { %p2206_p10 = scmp.ne.s32.totalorder %s2738_s17, %s2205_s12  ;;  %s2327_s24 = smov [#allocation18]  }
 0x557   : > { %s2209_s28 = sshll.u32 %s2327_s24, 4  ;;  %s2210_s28 = int_to_ptr.vmem [resolvable:$false] %s2209_s28 }
 0x558   : > { %p2207_p7 = pnand %p2206_p10, %p2851_p12  ;;  %p2212_p6 = scmp.lt.s32.totalorder %s2738_s17, %s2210_s28 }
 0x559   : > { %v1649_v8 = vld [vmem:[%s2852_s20] ss:$0 sm:$0xff] }
 0x55a   : > { %s2736_s18 = scalar_lea.hbm %s2853_s19, %s1655_s16  ;;  %p2208_p13 = pneg %p2207_p7 }
 0x55b   : > { %s2211_s16 = scalar_lea.vmem %s2210_s28, 256 }
 0x55c   : > { %p2213_p2 = scmp.lt.s32.totalorder %s2211_s16, %s2205_s12 }
 0x55e   : > { %p2214_p11 = por %p2213_p2, %p2212_p6 }
 0x560   : > { %p2215_p3 = pnand %p2214_p11, %p2208_p13 }
 0x606   : > { %v1345_v9 = vpop.f32.mrf.mxu1 }
 0x607   : > { %v1346_v10 = vadd.f32 %v1649_v8, %v1345_v9 }
 0x608   : > { %v1765_v11 = vpop.f32.mrf.mxu1 }
 0x609   : > { %1351 = vst.msk [vmem:[%s603_s27] sm:$0xff] %vm641_vm1, %v1346_v10 }
 0x60a   : > { %v1348_v12 = vpop.f32.mrf.mxu1 }
 0x60b   : > { %2218 = shalt.err (!%p2215_p3)
}
 0x60c   : > { %s2219_s13 = scalar_lea.hbm %s2736_s18, 128  ;;  %s2223_s21 = scalar_lea.hbm %s2853_s19, 256 }
 0x60d   : > { %p2220_p5 = scmp.ne.s32.totalorder %s2736_s18, %s2219_s13  ;;  %p2224_p8 = scmp.lt.s32.totalorder %s2736_s18, %s2853_s19 }
 0x60e   : > { %p2225_p9 = scmp.lt.s32.totalorder %s2223_s21, %s2219_s13 }
 0x60f   : > { %p2221_p0 = pnand %p2220_p5, %p2851_p12 }
 0x610   : > { %p2226_p1 = por %p2225_p9, %p2224_p8 }
 0x611   : > { %p2222_p4 = pneg %p2221_p0 }
 0x613   : > { %p2227_p10 = pnand %p2226_p1, %p2222_p4 }
 0x615   : > { %2230 = shalt.err (!%p2227_p10)
}
 0x616   : > { %1797 = dma.vmem_to_hbm [thread:$0]  (%p2851_p12), %s2738_s17, 128, %s2736_s18, %s1355_s25   ;;  %v1766_v13 = vpop.f32.mrf.mxu1 }
 0x617 PF: > { %s2854_s3 = sld [smem:[#allocation28_spill]] }
 0x618   : > { %s2855_s10 = sld [smem:[#allocation33_spill]] }
 0x619   : > { %s2856_s20 = sld [smem:[#allocation30_spill]] }
 0x61d   : > { %s1400_s27 = sand.u32 1, %s2854_s3  }
 0x61e   : > { %p2857_p7 = scmp.ne.s32.totalorder %s2855_s10, 0  ;;  %s1401_s15 = scalar_lea.sflag [#allocation5], %s1400_s27 }
 0x61f   : > { %p2858_p13 = scmp.ge.s32.totalorder %s2856_s20, 2 }
 0x621   : > { %p1831_p6 = pnand %p2858_p13, %p2857_p7 }
 0x623   : > { %p1832_p2 = pneg %p1831_p6 }
 0x625   : > { %2276 = dma.done.wait (%p1832_p2), %s1401_s15, 128  }
 0x626   : > { %2278 = vsyncadd (%p1832_p2), %s1401_s15, 4294967168  ;;  %s1410_s11 = scalar_lea.sflag [#allocation20], %s1400_s27 }
 0x627   : > { %2280 = dma.done.wait (%p1832_p2), %s1410_s11, 128  }
 0x628   : > { %2282 = vsyncadd (%p1832_p2), %s1410_s11, 4294967168  ;;  %s38_s26 = sadd.s32 1, %s2856_s20   ;;  %s2859_s29 = sld [smem:[#allocation32_spill]] }
 0x629   : > { %p35_p11 = scmp.ge.s32.totalorder %s38_s26, 4   ;;  %s2860_s24 = sld [smem:[#allocation29_spill]] }
 0x62a   : > { %s2861_s25 = sld [smem:[#allocation31_spill]]  ;;  %s2862_s21 = smov %s2289_s22 }
 0x62b   : > { %s2863_s22 = smov %s2293_s23  ;;  %37 = sbr.rel (!%p35_p11) target bundleno = 20 (0x14), region = 174 }
 0x62e   : > { %s2864_s23 = smov %s2859_s29 }
 0x630   :  { %1415 = vsyncpa [#allocation4], 1 }
 0x631   :  { %1417 = vsyncpa [#allocation4 + $0x1], 1 }
 0x632   :  { %1418 = vsyncpa [#allocation7], 1 }
 0x633   :  { %1420 = vsyncpa [#allocation7 + $0x1], 1 }
 0x634   :  { %1421 = vsyncpa [#allocation10], 1 }
 0x635   :  { %1422 = vsyncpa [#allocation13], 1 }
 0x636   :  { %1423 = vsyncpa [#allocation16], 1 }
 0x637   :  { %1424 = vsyncpa [#allocation5], 1 }
 0x638   :  { %1426 = vsyncpa [#allocation5 + $0x1], 1 }
 0x639   :  { %1427 = vsyncpa [#allocation20], 1 }
 0x63a   :  { %1429 = vsyncpa [#allocation20 + $0x1], 1 }

// kernel: tpu_custom_call.1
= control target key start
LH: loop header
LB: loop body
LE: loop exit
PB: predicated region body
PF: predicated region fallthrough
CT: control target
= control target key end

     0   :  { %s2785_s0 = inlined_call_operand.hbm [shape: f32[2,8,32], index: 0, kind: input, shape index: {}]   ;;  %s2786_s1 = inlined_call_operand.hbm [shape: f32[2,8,32], index: 1, kind: input, shape index: {}]   ;;  %s2787_s2 = inlined_call_operand.hbm [shape: f32[2,8,32], index: 2, kind: input, shape index: {}]   ;;  %s2788_s3 = inlined_call_operand.hbm [shape: bf16[32,32], index: 3, kind: input, shape index: {}]   ;;  %s2789_s4 = inlined_call_operand.hbm [shape: f32[1,32], index: 4, kind: input, shape index: {}]   ;;  %s2790_s5 = inlined_call_operand.hbm [shape: bf16[32,32], index: 5, kind: input, shape index: {}]   ;;  %s2791_s6 = inlined_call_operand.hbm [shape: f32[1,32], index: 6, kind: input, shape index: {}]   ;;  %s2792_s7 = inlined_call_operand.hbm [shape: bf16[32,32], index: 7, kind: input, shape index: {}]   ;;  %s2793_s8 = inlined_call_operand.hbm [shape: f32[1,32], index: 8, kind: input, shape index: {}]   ;;  %s2794_s9 = inlined_call_operand.vmem [shape: bf16[32,32], index: 9, kind: input, shape index: {}]   ;;  %s2795_s10 = inlined_call_operand.vmem [shape: f32[1,32], index: 10, kind: input, shape index: {}]   ;;  %s2796_s11 = inlined_call_operand.hbm [shape: f32[2,8,32], index: 11, kind: output, shape index: {0}]   ;;  %s2797_s12 = inlined_call_operand.hbm [shape: f32[2,8,8], index: 12, kind: output, shape index: {1}]  }
   0x1   :  { %2814 = sst [smem:[#allocation34_spill]] %s2788_s3 }
   0x2   :  { %2815 = sst [smem:[#allocation35_spill]] %s2790_s5 }
   0x3   :  { %2816 = sst [smem:[#allocation36_spill]] %s2792_s7 }
   0x4   :  { %2817 = sst [smem:[#allocation37_spill]] %s2795_s10 }
   0x5   :  { %2818 = sst [smem:[#allocation38_spill]] %s2796_s11 }
   0x6   :  { %2819 = sst [smem:[#allocation39_spill]] %s2797_s12 }
   0x7   :  { %18 = vsyncpa [#allocation4], 0 }
   0x8   :  { %20 = vsyncpa [#allocation4 + $0x1], 0 }
   0x9   :  { %21 = vsyncpa [#allocation7], 0 }
   0xa   :  { %23 = vsyncpa [#allocation7 + $0x1], 0 }
   0xb   :  { %24 = vsyncpa [#allocation10], 0 }
   0xc   :  { %25 = vsyncpa [#allocation13], 0 }
   0xd   :  { %26 = vsyncpa [#allocation16], 0 }
   0xe   :  { %27 = vsyncpa [#allocation5], 0 }
   0xf   :  { %29 = vsyncpa [#allocation5 + $0x1], 0 }
  0x10   :  { %30 = vsyncpa [#allocation20], 0 }
  0x11   :  { %32 = vsyncpa [#allocation20 + $0x1], 0  ;;  %s2393_s21 = smov 0   ;;  %s2395_s22 = smov 0  }
  0x12   :  { %s2397_s23 = smov 0   ;;  %s2399_s24 = smov 0  }
  0x13   :  { %s2401_s25 = smov 0   ;;  %s2403_s26 = smov 0  }
  0x14 LB: > { %2820 = sst [smem:[#allocation28_spill]] %s2285_s21  ;;  %s2424_s27 = sadd.s32 4294967295, %s2305_s26   ;;  %s2305_s26 = sphi %s2403_s26, %s38_s26   ;;  %s2301_s25 = sphi %s2401_s25, %s2861_s25   ;;  %s2297_s24 = sphi %s2399_s24, %s2860_s24   ;;  %s2293_s23 = sphi %s2397_s23, %s2864_s23   ;;  %s2289_s22 = sphi %s2395_s22, %s2863_s22   ;;  %s2285_s21 = sphi %s2393_s21, %s2862_s21  }
  0x15   : > { %2821 = sst [smem:[#allocation29_spill]] %s2301_s25  ;;  %p1603_p0 = scmp.ge.s32.totalorder %s2305_s26, 1 }
  0x16   : > { %2822 = sst [smem:[#allocation30_spill]] %s2305_s26  ;;  %p2799_p1 = scmp.eq.s32.totalorder %s2424_s27, 0 }
  0x17   : > { %p359_p2 = scmp.lt.s32.totalorder %s2305_s26, 3  ;;  %s2307_s29 = smov [#allocation9]  }
  0x18   : > { %s371_s30 = sshll.u32 %s2307_s29, 4  ;;  %s2308_s14 = smov [#allocation12]   ;;  %s372_s30 = int_to_ptr.vmem [resolvable:$true] %s371_s30 }
  0x19   : > { %p2429_p3 = pnand %p1603_p0, %p359_p2  ;;  %s395_s15 = sshll.u32 %s2308_s14, 4  ;;  %s396_s15 = int_to_ptr.vmem [resolvable:$true] %s395_s15 }
  0x1a   : > { %s2309_s16 = smov [#allocation15]   ;;  %s1950_s19 = scalar_lea.vmem %s372_s30, 256 }
  0x1b   : > { %s2823_s28 = scalar_select %p2429_p3, 1, 0 }
  0x1c   : > { %p1801_p4 = pneg %p2429_p3  ;;  %s419_s17 = sshll.u32 %s2309_s16, 4  ;;  %s420_s17 = int_to_ptr.vmem [resolvable:$true] %s419_s17 }
  0x1d   : > { %p1951_p8 = scmp.ne.s32.totalorder %s372_s30, %s1950_s19  ;;  %p1958_p11 = scmp.lt.s32.totalorder %s372_s30, %s372_s30 }
  0x1e   : > { %p2438_p6 = pnand %p1801_p4, %p2799_p1  ;;  %p1959_p12 = scmp.lt.s32.totalorder %s1950_s19, %s1950_s19 }
  0x20   : > { %s2824_s13 = scalar_select %p2438_p6, 1, 0 }
  0x21   : > { %p2444_p7 = pneg %p2438_p6  ;;  %p1960_p13 = por %p1959_p12, %p1958_p11 }
  0x23   : > { %p1953_p9 = pnand %p1951_p8, %p2444_p7 }
  0x25   : > { %p1954_p10 = pneg %p1953_p9 }
  0x27   : > { %p1961_p0 = pnand %p1960_p13, %p1954_p10 }
  0x29   : > { %1964 = shalt.err (!%p1961_p0)
}
  0x2a   : > { %s2310_s20 = smov 64   ;;  %s2311_s29 = smov 4  }
  0x2b   : > { %s2826_s3 = sld [smem:[#allocation34_spill]]  ;;  %s1976_s11 = scalar_lea.vmem %s396_s15, 256 }
  0x2c   : > { %p1977_p2 = scmp.ne.s32.totalorder %s396_s15, %s1976_s11  ;;  %p1984_p9 = scmp.lt.s32.totalorder %s396_s15, %s396_s15 }
  0x2d   : > { %p1985_p5 = scmp.lt.s32.totalorder %s1976_s11, %s1976_s11 }
  0x2e   : > { %p1979_p4 = pnand %p1977_p2, %p2444_p7 }
  0x2f   : > { %p1986_p1 = por %p1985_p5, %p1984_p9 }
  0x30   : > { %p1980_p8 = pneg %p1979_p4 }
  0x31   : > { %1804 = dma.hbm_to_vmem [thread:$0]  (!%p2438_p6), %s2826_s3, 256, %s372_s30, [#allocation10], %s2310_s20, %s2310_s20, %s2311_s29  }
  0x32   : > { %p1987_p11 = pnand %p1986_p1, %p1980_p8 }
  0x34   : > { %1990 = shalt.err (!%p1987_p11)
}
  0x35   : > { %s2827_s5 = sld [smem:[#allocation35_spill]]  ;;  %s2002_s14 = scalar_lea.vmem %s420_s17, 256 }
  0x36   : > { %p2003_p10 = scmp.ne.s32.totalorder %s420_s17, %s2002_s14  ;;  %p2010_p0 = scmp.lt.s32.totalorder %s420_s17, %s420_s17 }
  0x37   : > { %p2011_p2 = scmp.lt.s32.totalorder %s2002_s14, %s2002_s14 }
  0x38   : > { %p2005_p12 = pnand %p2003_p10, %p2444_p7 }
  0x39   : > { %p2012_p4 = por %p2011_p2, %p2010_p0 }
  0x3a   : > { %p2006_p13 = pneg %p2005_p12 }
  0x3b   : > { %1810 = dma.hbm_to_vmem [thread:$0]  (!%p2438_p6), %s2827_s5, 256, %s396_s15, [#allocation13], %s2310_s20, %s2310_s20, %s2311_s29  }
  0x3c   : > { %p2013_p3 = pnand %p2012_p4, %p2006_p13 }
  0x3e   : > { %2016 = shalt.err (!%p2013_p3)
}
  0x3f   : > { %s2828_s7 = sld [smem:[#allocation36_spill]]  ;;  %s1602_s10 = sadd.s32 4294967294, %s2305_s26  }
  0x40   : > { %s50_s15 = sadd.s32 1, %s2301_s25  ;;  %s59_s16 = sadd.s32 1, %s2293_s23 }
  0x41   : > { %p52_p1 = scmp.ge.s32.totalorder %s50_s15, 2  ;;  %p66_p3 = scmp.ne.s32.totalorder %s2293_s23, %s2289_s22 }
  0x42   : > { %p67_p5 = scmp.eq.s32.totalorder %s2305_s26, 0  ;;  %p72_p8 = scmp.ne.s32.totalorder %s2289_s22, %s2285_s21 }
  0x43   : > { %s2866_s15 = smov (%p52_p1, %s50_s15), 0  ;;  %p2831_p11 = scmp.eq.s32.totalorder %s2424_s27, 0 }
  0x44   : > { %2829 = sst [smem:[#allocation31_spill]] %s2866_s15  ;;  %p2479_p9 = por %p67_p5, %p66_p3 }
  0x45   : > { %1816 = dma.hbm_to_vmem [thread:$0]  (!%p2438_p6), %s2828_s7, 256, %s420_s17, [#allocation16], %s2310_s20, %s2310_s20, %s2311_s29  }
  0x46   : > { %p2485_p10 = por %p2831_p11, %p72_p8  ;;  %s54_s20 = ssub.s32 %s2301_s25, %s2866_s15 }
  0x47   : > { %p318_p12 = scmp.eq.s32.totalorder %s2424_s27, 1  ;;  %p57_p13 = scmp.eq.s32.totalorder %s54_s20, 0 }
  0x48   : > { %s2832_s17 = scalar_select %p2485_p10, 1, 0 }
  0x49   : > { %p324_p0 = scmp.eq.s32.totalorder %s1602_s10, 1  ;;  %p2492_p2 = por %p318_p12, %p66_p3 }
  0x4a   : > { %p1843_p4 = scmp.lt.s32.totalorder %s2305_s26, 2  ;;  %s2803_s30 = sand.u32 1, %s2293_s23  }
  0x4b   : > { %s2833_s29 = scalar_select %p2492_p2, 1, 0 }
  0x4c   : > { %s2498_s14 = scalar_select %p57_p13, %s2293_s23, %s59_s16  }
  0x4d   : > { %p2500_p1 = por %p324_p0, %p72_p8  ;;  %s2507_s3 = sshll.u32 %s2803_s30, 3 }
  0x4e   : > { %2834 = sst [smem:[#allocation32_spill]] %s2498_s14  ;;  %s2510_s5 = sshll.u32 %s2301_s25, 7 }
  0x4f   : > { %s2835_s11 = scalar_select %p2500_p1, 1, 0 }
  0x50   : > { %p2514_p3 = pnand %p1843_p4, %p2479_p9  ;;  %s469_s16 = sand.u32 1, %s2305_s26  }
  0x51   : > { %2836 = sst [smem:[#allocation33_spill]] %s2835_s11  ;;  %s478_s15 = scalar_lea.hbm %s2786_s1, %s2510_s5 }
  0x52   : > { %s473_s14 = scalar_lea.vmem [#allocation6], %s2507_s3  ;;  %s2312_s30 = smov [#allocation11]  }
  0x53   : > { %s480_s11 = sshll.u32 %s473_s14, 4  ;;  %s385_s21 = sshll.u32 %s2312_s30, 4  ;;  %s481_s11 = int_to_ptr.vmem [resolvable:$true] %s480_s11  ;;  %s386_s21 = int_to_ptr.vmem [resolvable:$true] %s385_s21 }
  0x54   : > { %s2524_s25 = scalar_lea.sflag [#allocation7], %s469_s16  ;;  %p2809_p5 = pneg %p2514_p3 }
  0x55   : > { %s2030_s19 = scalar_lea.vmem %s481_s11, 128  ;;  %s2313_s26 = smov [#allocation6]  }
  0x56   : > { %p2031_p8 = scmp.ne.s32.totalorder %s481_s11, %s2030_s19  ;;  %s2035_s12 = sshll.u32 %s2313_s26, 4  ;;  %s2036_s12 = int_to_ptr.vmem [resolvable:$false] %s2035_s12 }
  0x57   : > { %s2037_s7 = scalar_lea.vmem %s2036_s12, 256  ;;  %p2038_p12 = scmp.lt.s32.totalorder %s481_s11, %s2036_s12 }
  0x58   : > { %p2033_p9 = pnand %p2031_p8, %p2809_p5  ;;  %p2039_p13 = scmp.lt.s32.totalorder %s2037_s7, %s2030_s19 }
  0x5a   : > { %p2034_p11 = pneg %p2033_p9  ;;  %p2040_p0 = por %p2039_p13, %p2038_p12 }
  0x5c   : > { %p2041_p4 = pnand %p2040_p0, %p2034_p11 }
  0x5e   : > { %2044 = shalt.err (!%p2041_p4)
}
  0x5f   : > { %1826 = dma.hbm_to_vmem [thread:$0]  (!%p2514_p3), %s478_s15, 128, %s481_s11, %s2524_s25  }
  0x60   : > { %s2056_s14 = scalar_lea.vmem %s386_s21, 16  ;;  %s2063_s30 = scalar_lea.vmem %s386_s21, 32 }
  0x61   : > { %p2057_p1 = scmp.ne.s32.totalorder %s386_s21, %s2056_s14  ;;  %p2064_p5 = scmp.lt.s32.totalorder %s386_s21, %s386_s21 }
  0x62   : > { %p2065_p2 = scmp.lt.s32.totalorder %s2063_s30, %s2056_s14 }
  0x63   : > { %p2059_p8 = pnand %p2057_p1, %p2444_p7 }
  0x64   : > { %p2066_p10 = por %p2065_p2, %p2064_p5 }
  0x65   : > { %p2060_p9 = pneg %p2059_p8 }
  0x67   : > { %p2067_p6 = pnand %p2066_p10, %p2060_p9 }
  0x69   : > { %2070 = shalt.err (!%p2067_p6)
}
  0x6a   : > { %p2838_p11 = scmp.ne.s32.totalorder %s2824_s13, 0  ;;  %s2314_s15 = smov [#allocation14]  }
  0x6b   : > { %s409_s11 = sshll.u32 %s2314_s15, 4  ;;  %s2315_s16 = smov [#allocation17]   ;;  %s410_s11 = int_to_ptr.vmem [resolvable:$true] %s409_s11 }
  0x6c   : > { %1807 = dma.hbm_to_vmem [thread:$0]  (!%p2838_p11), %s2789_s4, 16, %s386_s21, [#allocation10]  }
  0x6d   : > { %s433_s20 = sshll.u32 %s2315_s16, 4  ;;  %s2082_s19 = scalar_lea.vmem %s410_s11, 16  ;;  %s434_s20 = int_to_ptr.vmem [resolvable:$true] %s433_s20 }
  0x6e   : > { %p2083_p1 = scmp.ne.s32.totalorder %s410_s11, %s2082_s19  ;;  %s2089_s7 = scalar_lea.vmem %s410_s11, 32 }
  0x6f   : > { %p2090_p10 = scmp.lt.s32.totalorder %s410_s11, %s410_s11  ;;  %p2091_p6 = scmp.lt.s32.totalorder %s2089_s7, %s2082_s19 }
  0x70   : > { %p2085_p12 = pnand %p2083_p1, %p2444_p7 }
  0x71   : > { %p2092_p2 = por %p2091_p6, %p2090_p10 }
  0x72   : > { %p2086_p13 = pneg %p2085_p12 }
  0x74   : > { %p2093_p5 = pnand %p2092_p2, %p2086_p13 }
  0x76   : > { %2096 = shalt.err (!%p2093_p5)
}
  0x77   : > { %1813 = dma.hbm_to_vmem [thread:$0]  (!%p2838_p11), %s2791_s6, 16, %s410_s11, [#allocation13]  }
  0x78   : > { %s2108_s30 = scalar_lea.vmem %s434_s20, 16  ;;  %s2115_s12 = scalar_lea.vmem %s434_s20, 32 }
  0x79   : > { %p2109_p0 = scmp.ne.s32.totalorder %s434_s20, %s2108_s30  ;;  %p2116_p9 = scmp.lt.s32.totalorder %s434_s20, %s434_s20 }
  0x7a   : > { %p2117_p1 = scmp.lt.s32.totalorder %s2115_s12, %s2108_s30 }
  0x7b   : > { %p2111_p4 = pnand %p2109_p0, %p2444_p7 }
  0x7c   : > { %p2118_p12 = por %p2117_p1, %p2116_p9 }
  0x7d   : > { %p2112_p8 = pneg %p2111_p4 }
  0x7f   : > { %p2119_p10 = pnand %p2118_p12, %p2112_p8 }
  0x81   : > { %2122 = shalt.err (!%p2119_p10)
}
  0x82   : > { %1819 = dma.hbm_to_vmem [thread:$0]  (!%p2838_p11), %s2793_s8, 16, %s434_s20, [#allocation16]  }
  0x83   : > { %s460_s16 = scalar_lea.hbm %s2785_s0, %s2510_s5  ;;  %s454_s19 = scalar_lea.vmem [#allocation3], %s2507_s3 }
  0x84   : > { %s462_s7 = sshll.u32 %s454_s19, 4  ;;  %s496_s13 = scalar_lea.hbm %s2787_s2, %s2510_s5  ;;  %s463_s7 = int_to_ptr.vmem [resolvable:$true] %s462_s7 }
  0x85   : > { %s2839_s30 = sand.u32 1, %s2293_s23   ;;  %s2136_s26 = scalar_lea.vmem %s463_s7, 128 }
  0x86   : > { %s451_s12 = scalar_lea.sflag [#allocation4], %s2839_s30  ;;  %p2137_p7 = scmp.ne.s32.totalorder %s463_s7, %s2136_s26 }
  0x87   : > { %p2840_p13 = pneg %p2514_p3  ;;  %s2316_s20 = smov [#allocation3]  }
  0x88   : > { %s2141_s15 = sshll.u32 %s2316_s20, 4  ;;  %s2142_s15 = int_to_ptr.vmem [resolvable:$false] %s2141_s15 }
  0x89   : > { %p2139_p6 = pnand %p2137_p7, %p2840_p13  ;;  %s2143_s18 = scalar_lea.vmem %s2142_s15, 256 }
  0x8a   : > { %p2144_p11 = scmp.lt.s32.totalorder %s463_s7, %s2142_s15  ;;  %p2145_p5 = scmp.lt.s32.totalorder %s2143_s18, %s2136_s26 }
  0x8b   : > { %p2140_p2 = pneg %p2139_p6 }
  0x8c   : > { %p2146_p0 = por %p2145_p5, %p2144_p11 }
  0x8e   : > { %p2147_p4 = pnand %p2146_p0, %p2140_p2 }
  0x90   : > { %2150 = shalt.err (!%p2147_p4)
}
  0x91   : > { %1823 = dma.hbm_to_vmem [thread:$0]  (!%p2514_p3), %s460_s16, 128, %s463_s7, %s451_s12  }
  0x92   : > { %s491_s11 = scalar_lea.vmem [#allocation8], %s2507_s3  ;;  %p2841_p9 = pmov %p2840_p13 }
  0x93   : > { %s498_s19 = sshll.u32 %s491_s11, 4  ;;  %s2317_s21 = smov [#allocation8]   ;;  %s499_s19 = int_to_ptr.vmem [resolvable:$true] %s498_s19 }
  0x94   : > { %s2164_s14 = scalar_lea.vmem %s499_s19, 128  ;;  %s2169_s30 = sshll.u32 %s2317_s21, 4  ;;  %s2170_s30 = int_to_ptr.vmem [resolvable:$false] %s2169_s30 }
  0x95   : > { %p2165_p8 = scmp.ne.s32.totalorder %s499_s19, %s2164_s14  ;;  %s2171_s26 = scalar_lea.vmem %s2170_s30, 256 }
  0x96   : > { %p2172_p10 = scmp.lt.s32.totalorder %s499_s19, %s2170_s30  ;;  %p2173_p7 = scmp.lt.s32.totalorder %s2171_s26, %s2164_s14 }
  0x97   : > { %p2167_p1 = pnand %p2165_p8, %p2841_p9 }
  0x98   : > { %p2174_p13 = por %p2173_p7, %p2172_p10 }
  0x99   : > { %p2168_p12 = pneg %p2167_p1 }
  0x9b   : > { %p2175_p6 = pnand %p2174_p13, %p2168_p12 }
  0x9d   : > { %2178 = shalt.err (!%p2175_p6)
}
  0x9e   : > { %1829 = dma.hbm_to_vmem [thread:$0]  (!%p2514_p3), %s496_s13, 128, %s499_s19, %s2524_s25  }
  0x9f   : > { %p2842_p2 = scmp.ne.s32.totalorder %s2823_s28, 0 }
  0xa0   : > { %s2586_s7 = sand.u32 (!%p2842_p2), 1, %s2289_s22   ;;  %p2843_p11 = scmp.ne.s32.totalorder (!%p2842_p2), %s2832_s17, 0 }
  0xa1   : > { %507 = sbr.rel (%p2842_p2) target bundleno = 1559 (0x617), region = 64  ;;  %s2589_s12 = sshll.u32 (!%p2842_p2), %s2586_s7, 3 }
  0xa2   : > { %s510_s10 = scalar_lea.sflag (!%p2842_p2), [#allocation4], %s2586_s7  ;;  %s513_s20 = scalar_lea.vmem (!%p2842_p2), [#allocation3], %s2589_s12 }
  0xa6   : > { %2256 = dma.done.wait (%p2843_p11), %s510_s10, 128  }
  0xa7   : > { %2258 = vsyncadd (%p2843_p11), %s510_s10, 4294967168  ;;  %s518_s5 = sand.u32 1, %s2424_s27   ;;  %s522_s28 = scalar_lea.vmem [#allocation6], %s2589_s12 }
  0xa8   : > { %s519_s25 = scalar_lea.sflag [#allocation7], %s518_s5 }
  0xa9   : > { %2260 = dma.done.wait (%p2843_p11), %s519_s25, 256  }
  0xaa   : > { %2262 = vsyncadd (%p2843_p11), %s519_s25, 4294967040  ;;  %s531_s13 = scalar_lea.vmem [#allocation8], %s2589_s12  ;;  %p2844_p3 = scmp.eq.s32.totalorder %s2424_s27, 0 }
  0xac   : > { %2264 = dma.done.wait (%p2844_p3), [#allocation10], 272   ;;  %p2845_p5 = pmov %p2844_p3 }
  0xad   : > { %p2846_p0 = pmov %p2844_p3 }
  0xae   : > { %2266 = vsyncadd (%p2845_p5), [#allocation10], 4294967024 }
  0xaf   : > { %2268 = dma.done.wait (%p2846_p0), [#allocation13], 272   ;;  %p2847_p4 = pmov %p2846_p0 }
  0xb0   : > { %p2848_p8 = pmov %p2846_p0 }
  0xb1   : > { %2270 = vsyncadd (%p2847_p4), [#allocation13], 4294967024 }
  0xb2   : > { %2272 = dma.done.wait (%p2848_p8), [#allocation16], 272   ;;  %p2849_p9 = pmov %p2846_p0 }
  0xb3   : > { %v2318_v0 = vmov 0.0   ;;  %vm2319_vm0 = vmmov 0   ;;  %v1915_v1 = vld [vmem:[#allocation9 + $0x8] sm:$0xff]   ;;  %v1916_v2 = vld [vmem:[#allocation12 + $0x8] sm:$0xff]   ;;  %v1918_v4 = vld [vmem:[#allocation12] sm:$0xff]   ;;  %vm641_vm1 = vcmask 261120  }
  0xb4   : > { %2274 = vsyncadd (%p2849_p9), [#allocation16], 4294967024  ;;  %1687 = vmatprep.subr.bf16.mxu0 %v2318_v0  ;;  %1695 = vmatprep.subr.bf16.mxu1 %v2318_v0  ;;  %v1917_v3 = vld [vmem:[#allocation9] sm:$0xff]   ;;  %v612_v5 = vld [vmem:[%s513_s20] sm:$0xff]  ;;  %vm821_vm2 = vcmask 64512   ;;  %s2320_s27 = smov 112  }
  0xb5   : > { %1691 = vmatprep.mubr.msk.bf16.mxu0 %vm2319_vm0, %v2318_v0  ;;  %1699 = vmatprep.mubr.msk.bf16.mxu1 %vm2319_vm0, %v2318_v0  ;;  %v614_v6 = vld [vmem:[%s522_s28] sm:$0xff]  ;;  %v613_v7 = vpack.c.bf16 %v612_v5, %v612_v5  ;;  %v1629_v9 = vld [vmem:[#allocation11] ss:$0 sm:$0xff]  ;;  %s2321_s17 = smov 120   ;;  %s2322_s15 = smov 104   ;;  %vm884_vm3 = vcmask 1043456  }
  0xb6   : > { %1688 = vmatpush3.bf16.msra.mxu0 %v1915_v1  ;;  %1696 = vmatpush3.bf16.msra.mxu1 %v1916_v2  ;;  %v615_v8 = vpack.c.bf16 %v614_v6, %v614_v6  ;;  %v1633_v10 = vld [vmem:[#allocation14] ss:$0 sm:$0xff]  ;;  %v1919_v25 = vld [vmem:[#allocation15 + $0x8] sm:$0xff]   ;;  %v1920_v26 = vld [vmem:[#allocation15] sm:$0xff]   ;;  %s610_s18 = scalar_lea.vmem [#allocation19], %s2589_s12  ;;  %s2323_s11 = smov 8  }
  0xb7   : > { %1689 = vmatprep.subr.bf16.mxu0 %v2318_v0  ;;  %1697 = vmatprep.subr.bf16.mxu1 %v2318_v0  ;;  %v616_v27 = vld [vmem:[%s531_s13] sm:$0xff]  ;;  %s2324_s26 = smov 16   ;;  %s2325_s3 = smov 24   ;;  %vm1047_vm4 = vcmask 130112   ;;  %vm1164_vm5 = vcmask 195712   ;;  %vm1281_vm6 = vcmask 261312  }
  0xb8   : > { %v617_v28 = vpack.c.bf16 %v616_v27, %v616_v27  ;;  %v1637_v43 = vld [vmem:[#allocation17] ss:$0 sm:$0xff]  ;;  %s1655_s16 = sshll.u32 %s2297_s24, 7  ;;  %s2850_s5 = sld [smem:[#allocation39_spill]] }
  0xb9   : > { %s1388_s28 = sshll.u32 %s610_s18, 4  ;;  %s1360_s13 = scalar_lea.sflag [#allocation20], %s2586_s7  ;;  %s1389_s28 = int_to_ptr.vmem [resolvable:$true] %s1388_s28 }
  0xba   : > { %1690 = vmatpush3.bf16.msra.mxu0 %v1917_v3  ;;  %1698 = vmatpush3.bf16.msra.mxu1 %v1918_v4  ;;  %p2851_p12 = scmp.ne.s32.totalorder %s2833_s29, 0 }
  0xbb   : > { %1703 = vmatprep.subr.bf16.mxu0 %v2318_v0  ;;  %1711 = vmatprep.subr.bf16.mxu1 %v2318_v0 }
  0xbd   : > { %1692 = vmatmul.mubr.msk.bf16.vlgmr.msra.gmra.mxu0 %vm641_vm1, %v613_v7  ;;  %1700 = vmatmul.mubr.msk.bf16.vlgmr.msra.gmra.mxu1 %vm641_vm1, %v615_v8 }
  0xbe   : > { %1707 = vmatprep.mubr.msk.bf16.mxu0 %vm2319_vm0, %v2318_v0  ;;  %1713 = vmatprep.mubr.msk.bf16.mxu1 %vm2319_vm0, %v2318_v0  ;;  %s1386_s25 = scalar_lea.hbm %s2850_s5, %s1655_s16 }
  0xbf   : > { %1704 = vmatpush3.bf16.msra.mxu0 %v1919_v25 }
  0xc0   : > { %1705 = vmatprep.subr.bf16.mxu0 %v2318_v0 }
  0xc3   : > { %1706 = vmatpush3.bf16.msra.mxu0 %v1920_v26 }
  0xc4   : > { %1717 = vmatprep.subr.bf16.mxu0 %v2318_v0 }
  0xc6   : > { %1708 = vmatmul.mubr.msk.bf16.vlgmr.msra.gmra.mxu0 %vm641_vm1, %v617_v28 }
  0xc7   : > { %1719 = vmatprep.mubr.msk.bf16.mxu0 %vm2319_vm0, %v2318_v0 }
 0x17d   : > { %v679_v11 = vpop.f32.mrf.mxu0  ;;  %v745_v13 = vpop.f32.mrf.mxu1 }
 0x17e   : > { %v680_v12 = vadd.f32 %v1629_v9, %v679_v11  ;;  %v746_v14 = vadd.f32 %v1633_v10, %v745_v13 }
 0x17f   : > { %v1693_v15 = vpop.f32.mrf.mxu0  ;;  %v1701_v17 = vpop.f32.mrf.mxu1 }
 0x180   : > { %v817_v16 = vmul.f32 0.35355338, %v680_v12  ;;  %v819_v18 = vpack.c.bf16 %v746_v14, %v746_v14 }
 0x181   : > { %v682_v19 = vpop.f32.mrf.mxu0  ;;  %v748_v20 = vpop.f32.mrf.mxu1 }
 0x182   : > { %v818_v21 = vpack.c.bf16 %v817_v16, %v817_v16  ;;  %1051 = vrot.lane.b32.xlu1 %v819_v18, %s2320_s27  ;;  %933 = vrot.lane.b32.xlu0 %v819_v18, %s2321_s17  ;;  %v826_v23 = vsel %vm821_vm2, %v819_v18, 0 }
 0x183   : > { %v1694_v22 = vpop.f32.mrf.mxu0  ;;  %v1702_v24 = vpop.f32.mrf.mxu1  ;;  %1712 = vmatpush3.bf16.xpose.msra.mxu1 %v826_v23 }
 0x184   : > { %1723 = vmatprep.subr.bf16.mxu1 %v2318_v0 }
 0x186   : > { %1049 = vrot.lane.b32.xlu1 %v818_v21, %s2320_s27  ;;  %930 = vrot.lane.b32.xlu0 %v818_v21, %s2321_s17  ;;  %v811_v44 = vpop.f32.mrf.mxu0 }
 0x187   : > { %v812_v45 = vadd.f32 %v1637_v43, %v811_v44 }
 0x188   : > { %v1709_v46 = vpop.f32.mrf.mxu0 }
 0x189   : > { %v820_v47 = vpack.c.bf16 %v812_v45, %v812_v45 }
 0x18a   : > { %1166 = vrot.lane.b32.xlu1 %v818_v21, %s2322_s15  ;;  %1168 = vrot.lane.b32.xlu0 %v819_v18, %s2322_s15  ;;  %v814_v48 = vpop.f32.mrf.mxu0 }
 0x18b   : > { %1714 = vmatmul.mubr.msk.bf16.vlgmr.msra.gmra.mxu1 %vm821_vm2, %v818_v21  ;;  %v886_v49 = vsel %vm884_vm3, %v820_v47, 0 }
 0x18c   : > { %1725 = vmatprep.mubr.msk.bf16.mxu1 %vm2319_vm0, %v2318_v0  ;;  %v1710_v50 = vpop.f32.mrf.mxu0  ;;  %1718 = vmatpush3.bf16.msra.mxu0 %v886_v49 }
 0x18d   : > { %1729 = vmatprep.subr.bf16.mxu0 %v2318_v0 }
 0x1f4   : > { %v934_v29 = vpop.permute.xlu0 %933  ;;  %v1052_v31 = vpop.permute.xlu1 %1051 }
 0x1f5   : > { %v939_v30 = vsel %vm821_vm2, %v934_v29, 0  ;;  %v1057_v33 = vsel %vm821_vm2, %v1052_v31, 0 }
 0x1f6   : > { %1724 = vmatpush3.bf16.xpose.msra.mxu1 %v939_v30 }
 0x1f7   : > { %1735 = vmatprep.subr.bf16.mxu1 %v2318_v0 }
 0x1f8   : > { %v931_v32 = vpop.permute.xlu0 %930  ;;  %v1050_v35 = vpop.permute.xlu1 %1049 }
 0x1fc   : > { %v1169_v34 = vpop.permute.xlu0 %1168  ;;  %v1167_v37 = vpop.permute.xlu1 %1166 }
 0x1fd   : > { %1726 = vmatmul.mubr.msk.bf16.vlgmr.msra.gmra.mxu1 %vm821_vm2, %v931_v32  ;;  %v1174_v36 = vsel %vm821_vm2, %v1169_v34, 0 }
 0x1fe   : > { %1736 = vmatpush3.bf16.xpose.msra.mxu1 %v1057_v33  ;;  %1737 = vmatprep.mubr.msk.bf16.mxu1 %vm2319_vm0, %v2318_v0 }
 0x1ff   : > { %1747 = vmatprep.subr.bf16.mxu1 %v2318_v0 }
 0x205   : > { %1738 = vmatmul.mubr.msk.bf16.vlgmr.msra.gmra.mxu1 %vm821_vm2, %v1050_v35 }
 0x206   : > { %1748 = vmatpush3.bf16.xpose.msra.mxu1 %v1174_v36  ;;  %1749 = vmatprep.mubr.msk.bf16.mxu1 %vm2319_vm0, %v2318_v0 }
 0x207   : > { %1759 = vmatprep.subr.bf16.mxu1 %v2318_v0 }
 0x20d   : > { %1750 = vmatmul.mubr.msk.bf16.vlgmr.msra.gmra.mxu1 %vm821_vm2, %v1167_v37 }
 0x20e   : > { %1763 = vmatprep.mubr.msk.bf16.mxu1 %vm2319_vm0, %v2318_v0 }
 0x24b   : > { %v862_v38 = vpop.f32.mrf.mxu1 }
 0x24c   : > { %v868_v39 = vsel %vm821_vm2, %v862_v38, -inf }
 0x24d   : > { %869 = vmax.xlane.f32.xlu0 %v868_v39  ;;  %v1715_v40 = vpop.f32.mrf.mxu1 }
 0x24f   : > { %v865_v41 = vpop.f32.mrf.mxu1 }
 0x251   : > { %v1716_v42 = vpop.f32.mrf.mxu1 }
 0x2bd   : > { %v975_v51 = vpop.f32.mrf.mxu1 }
 0x2be   : > { %v981_v52 = vsel %vm821_vm2, %v975_v51, -inf }
 0x2bf   : > { %982 = vmax.xlane.f32.xlu1 %v981_v52  ;;  %v1727_v53 = vpop.f32.mrf.mxu1 }
 0x2c1   : > { %v978_v54 = vpop.f32.mrf.mxu1 }
 0x2c3   : > { %v1728_v55 = vpop.f32.mrf.mxu1 }
 0x2c5   : > { %v1093_v56 = vpop.f32.mrf.mxu1 }
 0x2c6   : > { %v1099_v57 = vsel %vm821_vm2, %v1093_v56, -inf }
 0x2c7   : > { %1100 = vmax.xlane.f32.xlu0 %v1099_v57  ;;  %v1739_v58 = vpop.f32.mrf.mxu1 }
 0x2c8   : > { %v1922_v58 = vld [vmem:[%s2794_s9] sm:$0xff]  }
 0x2c9   : > { %v1096_v59 = vpop.f32.mrf.mxu1 }
 0x2cb   : > { %v1740_v60 = vpop.f32.mrf.mxu1 }
 0x2cd   : > { %v1210_v61 = vpop.f32.mrf.mxu1 }
 0x2ce   : > { %v1216_v62 = vsel %vm821_vm2, %v1210_v61, -inf }
 0x2cf   : > { %1217 = vmax.xlane.f32.xlu0 %v1216_v62  ;;  %v1751_v63 = vpop.f32.mrf.mxu1 }
 0x2d1   : > { %v1213_v1 = vpop.f32.mrf.mxu1 }
 0x2d3   : > { %v1752_v2 = vpop.f32.mrf.mxu1 }
 0x2d6   : > { %v870_v3 = vpop.xlane.xlu0 %869 }
 0x2d7   : > { %v871_v4 = vsub.f32 %v862_v38, %v870_v3 }
 0x2d9   : > { %v872_v5 = vmul.f32 1.442695, %v871_v4 }
 0x2db   : > { %1923 = vpow2.f32 %v872_v5 }
 0x2e8   : > { %v1924_v6 = vpop.eup %1923 }
 0x2e9   : > { %v874_v7 = vsel %vm821_vm2, %v1924_v6, 0.0 }
 0x2ea   : > { %875 = vadd.xlane.f32.xlu1 %v874_v7 }
 0x2fb   : > { %995 = vrot.lane.b32.xlu1 %v820_v47, %s2321_s17  ;;  %s2326_s17 = smov [#allocation19]  }
 0x348   : > { %v983_v8 = vpop.xlane.xlu1 %982 }
 0x349   : > { %v984_v9 = vsub.f32 %v975_v51, %v983_v8 }
 0x34b   : > { %v985_v10 = vmul.f32 1.442695, %v984_v9 }
 0x34d   : > { %1925 = vpow2.f32 %v985_v10 }
 0x350   : > { %v1101_v11 = vpop.xlane.xlu0 %1100 }
 0x351   : > { %v1102_v12 = vsub.f32 %v1093_v56, %v1101_v11  ;;  %v1921_v56 = vld [vmem:[%s2794_s9 + $0x8] sm:$0xff]  }
 0x352   : > { %1760 = vmatpush3.bf16.msra.mxu1 %v1921_v56 }
 0x353   : > { %v1103_v13 = vmul.f32 1.442695, %v1102_v12  ;;  %1761 = vmatprep.subr.bf16.mxu1 %v2318_v0 }
 0x355   : > { %1927 = vpow2.f32 %v1103_v13 }
 0x356   : > { %1762 = vmatpush3.bf16.msra.mxu1 %v1922_v58 }
 0x358   : > { %v1218_v14 = vpop.xlane.xlu0 %1217 }
 0x359   : > { %v1219_v15 = vsub.f32 %v1210_v61, %v1218_v14 }
 0x35a   : > { %v1926_v16 = vpop.eup %1925 }
 0x35b   : > { %v1220_v17 = vmul.f32 1.442695, %v1219_v15  ;;  %v987_v18 = vsel %vm821_vm2, %v1926_v16, 0.0 }
 0x35c   : > { %988 = vadd.xlane.f32.xlu0 %v987_v18 }
 0x35d   : > { %1929 = vpow2.f32 %v1220_v17 }
 0x362   : > { %v1928_v19 = vpop.eup %1927 }
 0x363   : > { %v1105_v20 = vsel %vm821_vm2, %v1928_v19, 0.0 }
 0x364   : > { %1106 = vadd.xlane.f32.xlu1 %v1105_v20 }
 0x36a   : > { %v1930_v21 = vpop.eup %1929 }
 0x36b   : > { %v1222_v22 = vsel %vm821_vm2, %v1930_v21, 0.0 }
 0x36c   : > { %1223 = vadd.xlane.f32.xlu0 %v1222_v22 }
 0x373   : > { %v876_v23 = vpop.xlane.xlu1 %875 }
 0x374   : > { %1931 = vrcp.f32 %v876_v23 }
 0x375   : > { %1229 = vrot.lane.b32.xlu1 %v820_v47, %s2322_s15  ;;  %s2183_s15 = sshll.u32 %s2326_s17, 4  ;;  %s2184_s15 = int_to_ptr.vmem [resolvable:$false] %s2183_s15 }
 0x376   : > { %p2186_p13 = scmp.lt.s32.totalorder %s1389_s28, %s2184_s15 }
 0x377   : > { %v996_v25 = vpop.permute.xlu1 %995 }
 0x378   : > { %v1001_v28 = vsel %vm884_vm3, %v996_v25, 0 }
 0x381   : > { %v1932_v24 = vpop.eup %1931 }
 0x382   : > { %1112 = vrot.lane.b32.xlu0 %v820_v47, %s2320_s27  ;;  %v878_v26 = vmul.f32 %v1932_v24, %v1924_v6  ;;  %s2179_s27 = scalar_lea.vmem %s1389_s28, 128 }
 0x383   : > { %p2180_p1 = scmp.ne.s32.totalorder %s1389_s28, %s2179_s27 }
 0x384   : > { %v880_v27 = vpack.c.bf16 %v878_v26, %v878_v26 }
 0x385   : > { %p2181_p10 = pnand %p2180_p1, %p2851_p12 }
 0x386   : > { %1720 = vmatmul.mubr.msk.bf16.vlgmr.msra.gmra.mxu0 %vm821_vm2, %v880_v27 }
 0x387   : > { %1730 = vmatpush3.bf16.msra.mxu0 %v1001_v28  ;;  %1731 = vmatprep.mubr.msk.bf16.mxu0 %vm2319_vm0, %v2318_v0  ;;  %p2182_p7 = pneg %p2181_p10 }
 0x388   : > { %1741 = vmatprep.subr.bf16.mxu0 %v2318_v0 }
 0x3e5   : > { %v989_v29 = vpop.xlane.xlu0 %988 }
 0x3e6   : > { %1933 = vrcp.f32 %v989_v29 }
 0x3ed   : > { %v1107_v30 = vpop.xlane.xlu1 %1106 }
 0x3ee   : > { %1935 = vrcp.f32 %v1107_v30 }
 0x3f1   : > { %v1230_v39 = vpop.permute.xlu1 %1229 }
 0x3f2   : > { %v1235_v41 = vsel %vm884_vm3, %v1230_v39, 0 }
 0x3f3   : > { %v1934_v31 = vpop.eup %1933 }
 0x3f4   : > { %v991_v32 = vmul.f32 %v1934_v31, %v1926_v16 }
 0x3f5   : > { %v1224_v33 = vpop.xlane.xlu0 %1223 }
 0x3f6   : > { %1937 = vrcp.f32 %v1224_v33  ;;  %v993_v34 = vpack.c.bf16 %v991_v32, %v991_v32  ;;  %v992_v42 = vadd.f32 %v991_v32, %v878_v26 }
 0x3f8   : > { %1732 = vmatmul.mubr.msk.bf16.vlgmr.msra.gmra.mxu0 %vm821_vm2, %v993_v34 }
 0x3f9   : > { %v1113_v35 = vpop.permute.xlu0 %1112  ;;  %1743 = vmatprep.mubr.msk.bf16.mxu0 %vm2319_vm0, %v2318_v0 }
 0x3fa   : > { %v1118_v36 = vsel %vm884_vm3, %v1113_v35, 0 }
 0x3fb   : > { %v1936_v37 = vpop.eup %1935  ;;  %1742 = vmatpush3.bf16.msra.mxu0 %v1118_v36 }
 0x3fc   : > { %1753 = vmatprep.subr.bf16.mxu0 %v2318_v0  ;;  %v1109_v38 = vmul.f32 %v1936_v37, %v1928_v19 }
 0x3fe   : > { %v1111_v40 = vpack.c.bf16 %v1109_v38, %v1109_v38  ;;  %v1110_v44 = vadd.f32 %v1109_v38, %v992_v42 }
 0x400   : > { %1744 = vmatmul.mubr.msk.bf16.vlgmr.msra.gmra.mxu0 %vm821_vm2, %v1111_v40 }
 0x401   : > { %1754 = vmatpush3.bf16.msra.mxu0 %v1235_v41  ;;  %1755 = vmatprep.mubr.msk.bf16.mxu0 %vm2319_vm0, %v2318_v0 }
 0x403   : > { %v1938_v43 = vpop.eup %1937 }
 0x404   : > { %v1226_v45 = vmul.f32 %v1938_v43, %v1930_v21 }
 0x406   : > { %v1228_v46 = vpack.c.bf16 %v1226_v45, %v1226_v45  ;;  %v1227_v47 = vadd.f32 %v1226_v45, %v1110_v44 }
 0x408   : > { %1756 = vmatmul.mubr.msk.bf16.vlgmr.msra.gmra.mxu0 %vm821_vm2, %v1228_v46  ;;  %v1352_v48 = vmul.f32 0.25, %v1227_v47 }
 0x40a   : > { %1353 = vst.msk [vmem:[%s610_s18] sm:$0xff] %vm821_vm2, %v1352_v48 }
 0x446   : > { %v922_v49 = vpop.f32.mrf.mxu0 }
 0x447   : > { %928 = vst.msk [vmem:[#allocation2] sm:$0xff] %vm821_vm2, %v922_v49 }
 0x448   : > { %v1721_v50 = vpop.f32.mrf.mxu0 }
 0x44a   : > { %v925_v51 = vpop.f32.mrf.mxu0 }
 0x44c   : > { %v1722_v52 = vpop.f32.mrf.mxu0 }
 0x4b8   : > { %v1037_v53 = vpop.f32.mrf.mxu0 }
 0x4b9   : > { %1044 = vrot.lane.b32.xlu1 %v1037_v53, %s2323_s11  ;;  %s2185_s11 = scalar_lea.vmem %s2184_s15, 256 }
 0x4ba   : > { %v1733_v54 = vpop.f32.mrf.mxu0  ;;  %p2187_p6 = scmp.lt.s32.totalorder %s2185_s11, %s2179_s27 }
 0x4bc   : > { %v1040_v55 = vpop.f32.mrf.mxu0  ;;  %p2188_p2 = por %p2187_p6, %p2186_p13 }
 0x4be   : > { %v1734_v57 = vpop.f32.mrf.mxu0  ;;  %p2189_p11 = pnand %p2188_p2, %p2182_p7 }
 0x4c0   : > { %v1154_v59 = vpop.f32.mrf.mxu0 }
 0x4c1   : > { %1161 = vrot.lane.b32.xlu0 %v1154_v59, %s2324_s26 }
 0x4c2   : > { %v1745_v60 = vpop.f32.mrf.mxu0 }
 0x4c4   : > { %v1157_v61 = vpop.f32.mrf.mxu0 }
 0x4c6   : > { %v1746_v62 = vpop.f32.mrf.mxu0 }
 0x4c8   : > { %v1271_v63 = vpop.f32.mrf.mxu0 }
 0x4c9   : > { %1278 = vrot.lane.b32.xlu1 %v1271_v63, %s2325_s3 }
 0x4ca   : > { %v1757_v1 = vpop.f32.mrf.mxu0 }
 0x4cc   : > { %v1274_v2 = vpop.f32.mrf.mxu0 }
 0x4ce   : > { %v1758_v3 = vpop.f32.mrf.mxu0 }
 0x52b   : > { %v1045_v4 = vpop.permute.xlu1 %1044 }
 0x52c   : > { %1048 = vst.msk [vmem:[#allocation2] sm:$0xff] %vm1047_vm4, %v1045_v4 }
 0x533   : > { %v1162_v0 = vpop.permute.xlu0 %1161 }
 0x534   : > { %1165 = vst.msk [vmem:[#allocation2] sm:$0xff] %vm1164_vm5, %v1162_v0 }
 0x53b   : > { %v1279_v5 = vpop.permute.xlu1 %1278 }
 0x53c   : > { %1282 = vst.msk [vmem:[#allocation2] sm:$0xff] %vm1281_vm6, %v1279_v5 }
 0x543   : > { %v1283_v6 = vld [vmem:[#allocation2] sm:$0xff] }
 0x544   : > { %v1284_v7 = vpack.c.bf16 %v1283_v6, %v1283_v6 }
 0x546   : > { %1764 = vmatmul.mubr.msk.bf16.vlgmr.msra.gmra.mxu1 %vm641_vm1, %v1284_v7 }
 0x547   : > { %2192 = shalt.err (!%p2189_p11)
}
 0x548   : > { %s2193_s19 = scalar_lea.hbm %s1386_s25, 128  ;;  %s2197_s21 = scalar_lea.hbm %s2850_s5, 256 }
 0x549   : > { %p2194_p3 = scmp.ne.s32.totalorder %s1386_s25, %s2193_s19  ;;  %p2198_p4 = scmp.lt.s32.totalorder %s1386_s25, %s2850_s5 }
 0x54a   : > { %p2199_p8 = scmp.lt.s32.totalorder %s2197_s21, %s2193_s19 }
 0x54b   : > { %p2195_p5 = pnand %p2194_p3, %p2851_p12 }
 0x54c   : > { %p2200_p9 = por %p2199_p8, %p2198_p4 }
 0x54d   : > { %p2196_p0 = pneg %p2195_p5 }
 0x54f   : > { %p2201_p1 = pnand %p2200_p9, %p2196_p0 }
 0x551   : > { %2204 = shalt.err (!%p2201_p1)
}
 0x552   : > { %1798 = dma.vmem_to_hbm [thread:$0]  (%p2851_p12), %s1389_s28, 128, %s1386_s25, %s1360_s13  }
 0x553   : > { %s2852_s20 = sld [smem:[#allocation37_spill]]  ;;  %s603_s27 = scalar_lea.vmem [#allocation18], %s2589_s12 }
 0x554   : > { %s1374_s17 = sshll.u32 %s603_s27, 4  ;;  %s2853_s19 = sld [smem:[#allocation38_spill]]  ;;  %s2738_s17 = int_to_ptr.vmem [resolvable:$true] %s1374_s17 }
 0x555   : > { %s1355_s25 = scalar_lea.sflag [#allocation5], %s2586_s7  ;;  %s2205_s12 = scalar_lea.vmem %s2738_s17, 128 }
 0x556   : > { %p2206_p10 = scmp.ne.s32.totalorder %s2738_s17, %s2205_s12  ;;  %s2327_s24 = smov [#allocation18]  }
 0x557   : > { %s2209_s28 = sshll.u32 %s2327_s24, 4  ;;  %s2210_s28 = int_to_ptr.vmem [resolvable:$false] %s2209_s28 }
 0x558   : > { %p2207_p7 = pnand %p2206_p10, %p2851_p12  ;;  %p2212_p6 = scmp.lt.s32.totalorder %s2738_s17, %s2210_s28 }
 0x559   : > { %v1649_v8 = vld [vmem:[%s2852_s20] ss:$0 sm:$0xff] }
 0x55a   : > { %s2736_s18 = scalar_lea.hbm %s2853_s19, %s1655_s16  ;;  %p2208_p13 = pneg %p2207_p7 }
 0x55b   : > { %s2211_s16 = scalar_lea.vmem %s2210_s28, 256 }
 0x55c   : > { %p2213_p2 = scmp.lt.s32.totalorder %s2211_s16, %s2205_s12 }
 0x55e   : > { %p2214_p11 = por %p2213_p2, %p2212_p6 }
 0x560   : > { %p2215_p3 = pnand %p2214_p11, %p2208_p13 }
 0x606   : > { %v1345_v9 = vpop.f32.mrf.mxu1 }
 0x607   : > { %v1346_v10 = vadd.f32 %v1649_v8, %v1345_v9 }
 0x608   : > { %v1765_v11 = vpop.f32.mrf.mxu1 }
 0x609   : > { %1351 = vst.msk [vmem:[%s603_s27] sm:$0xff] %vm641_vm1, %v1346_v10 }
 0x60a   : > { %v1348_v12 = vpop.f32.mrf.mxu1 }
 0x60b   : > { %2218 = shalt.err (!%p2215_p3)
}
 0x60c   : > { %s2219_s13 = scalar_lea.hbm %s2736_s18, 128  ;;  %s2223_s21 = scalar_lea.hbm %s2853_s19, 256 }
 0x60d   : > { %p2220_p5 = scmp.ne.s32.totalorder %s2736_s18, %s2219_s13  ;;  %p2224_p8 = scmp.lt.s32.totalorder %s2736_s18, %s2853_s19 }
 0x60e   : > { %p2225_p9 = scmp.lt.s32.totalorder %s2223_s21, %s2219_s13 }
 0x60f   : > { %p2221_p0 = pnand %p2220_p5, %p2851_p12 }
 0x610   : > { %p2226_p1 = por %p2225_p9, %p2224_p8 }
 0x611   : > { %p2222_p4 = pneg %p2221_p0 }
 0x613   : > { %p2227_p10 = pnand %p2226_p1, %p2222_p4 }
 0x615   : > { %2230 = shalt.err (!%p2227_p10)
}
 0x616   : > { %1797 = dma.vmem_to_hbm [thread:$0]  (%p2851_p12), %s2738_s17, 128, %s2736_s18, %s1355_s25   ;;  %v1766_v13 = vpop.f32.mrf.mxu1 }
 0x617 PF: > { %s2854_s3 = sld [smem:[#allocation28_spill]] }
 0x618   : > { %s2855_s10 = sld [smem:[#allocation33_spill]] }
 0x619   : > { %s2856_s20 = sld [smem:[#allocation30_spill]] }
 0x61d   : > { %s1400_s27 = sand.u32 1, %s2854_s3  }
 0x61e   : > { %p2857_p7 = scmp.ne.s32.totalorder %s2855_s10, 0  ;;  %s1401_s15 = scalar_lea.sflag [#allocation5], %s1400_s27 }
 0x61f   : > { %p2858_p13 = scmp.ge.s32.totalorder %s2856_s20, 2 }
 0x621   : > { %p1831_p6 = pnand %p2858_p13, %p2857_p7 }
 0x623   : > { %p1832_p2 = pneg %p1831_p6 }
 0x625   : > { %2276 = dma.done.wait (%p1832_p2), %s1401_s15, 128  }
 0x626   : > { %2278 = vsyncadd (%p1832_p2), %s1401_s15, 4294967168  ;;  %s1410_s11 = scalar_lea.sflag [#allocation20], %s1400_s27 }
 0x627   : > { %2280 = dma.done.wait (%p1832_p2), %s1410_s11, 128  }
 0x628   : > { %2282 = vsyncadd (%p1832_p2), %s1410_s11, 4294967168  ;;  %s38_s26 = sadd.s32 1, %s2856_s20   ;;  %s2859_s29 = sld [smem:[#allocation32_spill]] }
 0x629   : > { %p35_p11 = scmp.ge.s32.totalorder %s38_s26, 4   ;;  %s2860_s24 = sld [smem:[#allocation29_spill]] }
 0x62a   : > { %s2861_s25 = sld [smem:[#allocation31_spill]]  ;;  %s2862_s21 = smov %s2289_s22 }
 0x62b   : > { %s2863_s22 = smov %s2293_s23  ;;  %37 = sbr.rel (!%p35_p11) target bundleno = 20 (0x14), region = 174 }
 0x62e   : > { %s2864_s23 = smov %s2859_s29 }
 0x630   :  { %1415 = vsyncpa [#allocation4], 1 }
 0x631   :  { %1417 = vsyncpa [#allocation4 + $0x1], 1 }
 0x632   :  { %1418 = vsyncpa [#allocation7], 1 }
 0x633   :  { %1420 = vsyncpa [#allocation7 + $0x1], 1 }
 0x634   :  { %1421 = vsyncpa [#allocation10], 1 }
 0x635   :  { %1422 = vsyncpa [#allocation13], 1 }
 0x636   :  { %1423 = vsyncpa [#allocation16], 1 }
 0x637   :  { %1424 = vsyncpa [#allocation5], 1 }
 0x638   :  { %1426 = vsyncpa [#allocation5 + $0x1], 1 }
 0x639   :  { %1427 = vsyncpa [#allocation20], 1 }
 0x63a   :  { %1429 = vsyncpa [#allocation20 + $0x1], 1 }

</bundles_post_ra>
